<compile_context>
chip_gen: v6e
topology: v6e:2x2x1
jax: 0.10.0
libtpu: 0.0.40
codegen_flags: <defaults>
</compile_context>

<pallas_src>
import jax
import jax.numpy as jnp
from jax.experimental import pallas as pl
from jax.experimental.pallas import tpu as pltpu


def _round_up(x, m):
    return (x + m - 1) // m * m


def _make_kernel(n_convs, seq_len):
    """Kernel over one batch tile of TB samples.

    refs = [x, (w_i, b_i) * n_convs, wl1, bl1, wl2, bl2, out]
      x    : (TB, L*K)          flattened (length, channel) minor dim (lane-dense DMA)
      w_i  : (3*Cin_i, Cout_i)  im2col-packed taps: rows [tap l-1 | tap l | tap l+1]
      b_i  : (1, Cout_i)
      wl1  : (Cf, 256),  bl1 : (1, 256)
      wl2  : (256, 128), bl2 : (1, 128)
      out  : (TB, 128)
    """
    L = seq_len

    def kernel(*refs):
        x_ref = refs[0]
        conv_refs = refs[1:1 + 2 * n_convs]
        wl1_ref, bl1_ref, wl2_ref, bl2_ref = refs[1 + 2 * n_convs:5 + 2 * n_convs]
        out_ref = refs[-1]

        TB, LK = x_ref.shape
        K = LK // L
        M = TB * L

        xf = x_ref[...].astype(jnp.float32)                         # (TB, L*K)

        # Unfold to position-major rows: row m = l*TB + b holds (sample b, position l).
        # Built from static lane slices + sublane concatenation (no lane->sublane
        # reshape), so it lowers robustly.
        h = jnp.concatenate([xf[:, l * K:(l + 1) * K] for l in range(L)], axis=0)  # (M, K)
        # TODO(synk): for very large L, replace this unrolled unfold (and the max below)
        # with a fori_loop writing into a VMEM scratch.

        # Position masks, hoisted out of the layer loop.
        row = jax.lax.broadcasted_iota(jnp.int32, (M, 1), 0)
        is_first = row < TB            # position l == 0
        is_last = row >= M - TB        # position l == L-1

        # NOTE: reflect padding (like torch) requires L >= 2 (asserted in the wrapper).
        # Roll wraparound only touches the l==0 / l==L-1 row blocks, which are exactly
        # the rows the reflect fix-up overwrites, so rolling the flattened tile is safe.
        for i in range(n_convs):
            w_ref = conv_refs[2 * i]          # (3*Cin, Cout)
            b_ref = conv_refs[2 * i + 1]      # (1, Cout)

            up = pltpu.roll(h, shift=TB, axis=0)        # h at position l-1
            dn = pltpu.roll(h, shift=M - TB, axis=0)    # h at position l+1
            left = jnp.where(is_first, dn, up)          # reflect: l = 0   -> l = 1
            right = jnp.where(is_last, up, dn)          # reflect: l = L-1 -> l = L-2
            hcat = jnp.concatenate([left, h, right], axis=1)        # (M, 3*Cin)

            h = jnp.dot(hcat.astype(w_ref.dtype), w_ref[...],
                        preferred_element_type=jnp.float32) + b_ref[...]
            if i >= 1:          # torch module: no ReLU after the first conv
                h = jnp.maximum(h, 0.0)

        # torch.max(out, 2).values -> max over positions = max over the L row blocks.
        feat = h[0:TB, :]
        for l in range(1, L):
            feat = jnp.maximum(feat, h[l * TB:(l + 1) * TB, :])     # (TB, Cf)

        # Linear -> ReLU -> Linear on the whole batch tile.
        z = jnp.dot(feat.astype(wl1_ref.dtype), wl1_ref[...],
                    preferred_element_type=jnp.float32) + bl1_ref[...]
        z = jnp.maximum(z, 0.0)
        y = jnp.dot(z.astype(wl2_ref.dtype), wl2_ref[...],
                    preferred_element_type=jnp.float32) + bl2_ref[...]
        out_ref[...] = y.astype(out_ref.dtype)                      # (TB, 128)

    return kernel


def prepare_params(conv_ws, conv_bs, lin1_w, lin1_b, lin2_w, lin2_b,
                   matmul_dtype=jnp.float32):
    """One-time weight repacking (hoisted out of the per-call path).

    conv_ws[i]: (Cout, Cin, 3) torch layout; lin*_w: (out, in) torch layout.
    Returns a flat tuple: (w0, b0, w1, b1, ..., wl1, bl1, wl2, bl2).
    """
    packed = []
    for w, bvec in zip(conv_ws, conv_bs):
        c_out, c_in, taps = w.shape
        assert taps == 3
        # (Cout, Cin, 3) -> (3, Cin, Cout) -> (3*Cin, Cout): row t*Cin + i multiplies
        # input channel i at position l + t - 1 (reflect at the edges).
        wp = jnp.transpose(w, (2, 1, 0)).reshape(3 * c_in, c_out).astype(matmul_dtype)
        bp = bvec.reshape(1, c_out).astype(jnp.float32)
        packed += [wp, bp]
    wl1 = lin1_w.T.astype(matmul_dtype)                 # (f_last, 256)
    bl1 = lin1_b.reshape(1, -1).astype(jnp.float32)
    wl2 = lin2_w.T.astype(matmul_dtype)                 # (256, 128)
    bl2 = lin2_b.reshape(1, -1).astype(jnp.float32)
    return tuple(packed) + (wl1, bl1, wl2, bl2)


def contrastive_forward(x, params, *, block_b=128, min_grid_steps=2):
    """x: (B, L, K). params from prepare_params(). Returns (B, 128) float32.

    block_b: max batch tile (sweep up to 256-512 on v6e for large B; keep <= 256 on
    v7x). min_grid_steps: keep >= 2 so v7x megacore can shard the batch axis.
    """
    B, L, K = x.shape
    assert L >= 2, "reflect padding=1 requires a length axis >= 2 (as in torch)"
    n_convs = (len(params) - 4) // 2
    out_dim = params[-2].shape[1]           # wl2: (256, 128) -> 128

    # Batch tile: multiple of 8 sublanes, capped so there are >= min_grid_steps steps.
    block_b = max(8, (block_b // 8) * 8)
    TB = max(8, min(block_b, _round_up(pl.cdiv(B, min_grid_steps), 8)))
    Bp = _round_up(B, TB)
    xw = x if Bp == B else jnp.pad(x, ((0, Bp - B), (0, 0), (0, 0)))
    # Lane-dense minor dim (L*K) for the HBM->VMEM DMA; kernel unfolds back to (M, K).
    xw = xw.reshape(Bp, L * K)

    in_specs = [pl.BlockSpec((TB, L * K), lambda b: (b, 0))]
    in_specs += [pl.BlockSpec(p.shape, lambda b: (0, 0)) for p in params]

    out = pl.pallas_call(
        _make_kernel(n_convs, L),
        out_shape=jax.ShapeDtypeStruct((Bp, out_dim), jnp.float32),
        grid=(Bp // TB,),
        in_specs=in_specs,
        out_specs=pl.BlockSpec((TB, out_dim), lambda b: (b, 0)),
        compiler_params=pltpu.CompilerParams(
            dimension_semantics=("parallel",),
            vmem_limit_bytes=48 * 1024 * 1024,
        ),
    )(xw, *params)
    return out[:B] if Bp != B else out


def ref_forward(x, conv_ws, conv_bs, lin1_w, lin1_b, lin2_w, lin2_b):
    """Pure-JAX reference mirroring the torch module exactly (NCW conv)."""
    h = jnp.transpose(x, (0, 2, 1)).astype(jnp.float32)              # (B, Cin, L)
    for i, (w, bvec) in enumerate(zip(conv_ws, conv_bs)):
        hp = jnp.pad(h, ((0, 0), (0, 0), (1, 1)), mode="reflect")
        h = jax.lax.conv_general_dilated(
            hp, w.astype(jnp.float32), (1,), "VALID",
            dimension_numbers=("NCH", "OIH", "NCH"))
        h = h + bvec[None, :, None]
        if i >= 1:
            h = jnp.maximum(h, 0.0)
    feat = jnp.max(h, axis=2)                                        # (B, f_last)
    z = jnp.maximum(feat @ lin1_w.T + lin1_b, 0.0)
    return z @ lin2_w.T + lin2_b


if __name__ == "__main__":
    # Small shapes consistent with the module: in_size=k=4, filters=[8, 16]
    B, L, K = 20, 16, 4
    filters = [8, 16]

    key = jax.random.PRNGKey(0)
    keys = jax.random.split(key, 16)

    # Deterministic synthetic parameters (torch layouts)
    conv_ws, conv_bs = [], []
    c_in = K
    ki = 0
    for c_out in filters:
        conv_ws.append(0.1 * jax.random.normal(keys[ki], (c_out, c_in, 3), jnp.float32)); ki += 1
        conv_bs.append(0.1 * jax.random.normal(keys[ki], (c_out,), jnp.float32)); ki += 1
        c_in = c_out
    lin1_w = 0.1 * jax.random.normal(keys[ki], (256, filters[-1]), jnp.float32); ki += 1
    lin1_b = 0.1 * jax.random.normal(keys[ki], (256,), jnp.float32); ki += 1
    lin2_w = 0.1 * jax.random.normal(keys[ki], (128, 256), jnp.float32); ki += 1
    lin2_b = 0.1 * jax.random.normal(keys[ki], (128,), jnp.float32); ki += 1

    x = jax.random.normal(keys[ki], (B, L, K), jnp.float32)

    # One-time weight repacking (kept out of the per-call path).
    params = prepare_params(conv_ws, conv_bs, lin1_w, lin1_b, lin2_w, lin2_b)

    # Defaults give TB=16 -> 2 grid steps with batch padding (Bp=32) on this tiny B;
    # production batches use block_b up to 128-512 depending on chip/VMEM.
    out = contrastive_forward(x, params)
    out = jax.block_until_ready(out)

    expected = ref_forward(x, conv_ws, conv_bs, lin1_w, lin1_b, lin2_w, lin2_b)
    assert out.shape == (B, 128), out.shape
    assert jnp.allclose(out, expected, rtol=1e-4, atol=1e-4), (
        float(jnp.max(jnp.abs(out - expected))))

    print("KERNEL_OK")
</pallas_src>

<mosaic_0001>
module attributes {stable_mosaic.version = 11 : i64} {
  func.func @kernel(%arg0: i32, %arg1: memref<16x64xf32, #tpu.memory_space<vmem>>, %arg2: memref<12x8xf32, #tpu.memory_space<vmem>>, %arg3: memref<1x8xf32, #tpu.memory_space<vmem>>, %arg4: memref<24x16xf32, #tpu.memory_space<vmem>>, %arg5: memref<1x16xf32, #tpu.memory_space<vmem>>, %arg6: memref<16x256xf32, #tpu.memory_space<vmem>>, %arg7: memref<1x256xf32, #tpu.memory_space<vmem>>, %arg8: memref<256x128xf32, #tpu.memory_space<vmem>>, %arg9: memref<1x128xf32, #tpu.memory_space<vmem>>, %arg10: memref<16x128xf32, #tpu.memory_space<vmem>>) attributes {dimension_semantics = [#tpu.dimension_semantics<parallel>], iteration_bounds = array<i64: 2>, scalar_prefetch = 0 : i64, scratch_operands = 0 : i64, tpu.core_type = #tpu.core_type<tc>, window_params = [{transform_indices = @transform_0, window_bounds = array<i64: 16, 64>}, {pipeline_mode = #tpu.pipeline_mode<synchronous>, transform_indices = @transform_1, window_bounds = array<i64: 12, 8>}, {pipeline_mode = #tpu.pipeline_mode<synchronous>, transform_indices = @transform_2, window_bounds = array<i64: 1, 8>}, {pipeline_mode = #tpu.pipeline_mode<synchronous>, transform_indices = @transform_3, window_bounds = array<i64: 24, 16>}, {pipeline_mode = #tpu.pipeline_mode<synchronous>, transform_indices = @transform_4, window_bounds = array<i64: 1, 16>}, {pipeline_mode = #tpu.pipeline_mode<synchronous>, transform_indices = @transform_5, window_bounds = array<i64: 16, 256>}, {pipeline_mode = #tpu.pipeline_mode<synchronous>, transform_indices = @transform_6, window_bounds = array<i64: 1, 256>}, {pipeline_mode = #tpu.pipeline_mode<synchronous>, transform_indices = @transform_7, window_bounds = array<i64: 256, 128>}, {pipeline_mode = #tpu.pipeline_mode<synchronous>, transform_indices = @transform_8, window_bounds = array<i64: 1, 128>}, {transform_indices = @transform_9, window_bounds = array<i64: 16, 128>}]} {
    %c0 = arith.constant 0 : index
    %c0_0 = arith.constant 0 : index
    %0 = vector.load %arg1[%c0, %c0_0] : memref<16x64xf32, #tpu.memory_space<vmem>>, vector<16x64xf32>
    %1 = vector.extract_strided_slice %0 {offsets = [0, 0], sizes = [16, 4], strides = [1, 1]} : vector<16x64xf32> to vector<16x4xf32>
    %2 = vector.extract_strided_slice %0 {offsets = [0, 4], sizes = [16, 4], strides = [1, 1]} : vector<16x64xf32> to vector<16x4xf32>
    %3 = vector.extract_strided_slice %0 {offsets = [0, 8], sizes = [16, 4], strides = [1, 1]} : vector<16x64xf32> to vector<16x4xf32>
    %4 = vector.extract_strided_slice %0 {offsets = [0, 12], sizes = [16, 4], strides = [1, 1]} : vector<16x64xf32> to vector<16x4xf32>
    %5 = vector.extract_strided_slice %0 {offsets = [0, 16], sizes = [16, 4], strides = [1, 1]} : vector<16x64xf32> to vector<16x4xf32>
    %6 = vector.extract_strided_slice %0 {offsets = [0, 20], sizes = [16, 4], strides = [1, 1]} : vector<16x64xf32> to vector<16x4xf32>
    %7 = vector.extract_strided_slice %0 {offsets = [0, 24], sizes = [16, 4], strides = [1, 1]} : vector<16x64xf32> to vector<16x4xf32>
    %8 = vector.extract_strided_slice %0 {offsets = [0, 28], sizes = [16, 4], strides = [1, 1]} : vector<16x64xf32> to vector<16x4xf32>
    %9 = vector.extract_strided_slice %0 {offsets = [0, 32], sizes = [16, 4], strides = [1, 1]} : vector<16x64xf32> to vector<16x4xf32>
    %10 = vector.extract_strided_slice %0 {offsets = [0, 36], sizes = [16, 4], strides = [1, 1]} : vector<16x64xf32> to vector<16x4xf32>
    %11 = vector.extract_strided_slice %0 {offsets = [0, 40], sizes = [16, 4], strides = [1, 1]} : vector<16x64xf32> to vector<16x4xf32>
    %12 = vector.extract_strided_slice %0 {offsets = [0, 44], sizes = [16, 4], strides = [1, 1]} : vector<16x64xf32> to vector<16x4xf32>
    %13 = vector.extract_strided_slice %0 {offsets = [0, 48], sizes = [16, 4], strides = [1, 1]} : vector<16x64xf32> to vector<16x4xf32>
    %14 = vector.extract_strided_slice %0 {offsets = [0, 52], sizes = [16, 4], strides = [1, 1]} : vector<16x64xf32> to vector<16x4xf32>
    %15 = vector.extract_strided_slice %0 {offsets = [0, 56], sizes = [16, 4], strides = [1, 1]} : vector<16x64xf32> to vector<16x4xf32>
    %16 = vector.extract_strided_slice %0 {offsets = [0, 60], sizes = [16, 4], strides = [1, 1]} : vector<16x64xf32> to vector<16x4xf32>
    %17 = tpu.concatenate %1, %2, %3, %4, %5, %6, %7, %8, %9, %10, %11, %12, %13, %14, %15, %16 in 0 : vector<16x4xf32>, vector<16x4xf32>, vector<16x4xf32>, vector<16x4xf32>, vector<16x4xf32>, vector<16x4xf32>, vector<16x4xf32>, vector<16x4xf32>, vector<16x4xf32>, vector<16x4xf32>, vector<16x4xf32>, vector<16x4xf32>, vector<16x4xf32>, vector<16x4xf32>, vector<16x4xf32>, vector<16x4xf32> -> vector<256x4xf32>
    %18 = tpu.iota {dimensions = array<i32: 0>} : vector<256x1xi32>
    %c16_i32 = arith.constant 16 : i32
    %19 = vector.broadcast %c16_i32 : i32 to vector<256x1xi32>
    %20 = arith.cmpi slt, %18, %19 : vector<256x1xi32>
    %c240_i32 = arith.constant 240 : i32
    %21 = vector.broadcast %c240_i32 : i32 to vector<256x1xi32>
    %22 = arith.cmpi sge, %18, %21 : vector<256x1xi32>
    %c16_i32_1 = arith.constant 16 : i32
    %23 = tpu.dynamic_rotate %17 by %c16_i32_1 dim 0 : vector<256x4xf32>, i32 -> vector<256x4xf32>
    %c240_i32_2 = arith.constant 240 : i32
    %24 = tpu.dynamic_rotate %17 by %c240_i32_2 dim 0 : vector<256x4xf32>, i32 -> vector<256x4xf32>
    %25 = vector.shape_cast %20 : vector<256x1xi1> to vector<256x1xi1>
    %26 = vector.broadcast %25 : vector<256x1xi1> to vector<256x4xi1>
    %27 = arith.select %26, %24, %23 : vector<256x4xi1>, vector<256x4xf32>
    %28 = vector.shape_cast %22 : vector<256x1xi1> to vector<256x1xi1>
    %29 = vector.broadcast %28 : vector<256x1xi1> to vector<256x4xi1>
    %30 = arith.select %29, %23, %24 : vector<256x4xi1>, vector<256x4xf32>
    %31 = tpu.concatenate %27, %17, %30 in 1 : vector<256x4xf32>, vector<256x4xf32>, vector<256x4xf32> -> vector<256x12xf32>
    %c0_3 = arith.constant 0 : index
    %c0_4 = arith.constant 0 : index
    %32 = vector.load %arg2[%c0_3, %c0_4] : memref<12x8xf32, #tpu.memory_space<vmem>>, vector<12x8xf32>
    %cst = arith.constant dense<0.000000e+00> : vector<256x8xf32>
    %33 = tpu.matmul %31, %32, %cst {dimension_numbers = #tpu.dot_dimension_numbers<[1], [0], [0], [1], [0, 0, 1, 1], [], []>} : vector<256x12xf32>, vector<12x8xf32>, vector<256x8xf32> -> vector<256x8xf32>
    %c0_5 = arith.constant 0 : index
    %c0_6 = arith.constant 0 : index
    %34 = vector.load %arg3[%c0_5, %c0_6] : memref<1x8xf32, #tpu.memory_space<vmem>>, vector<1x8xf32>
    %35 = vector.broadcast %34 : vector<1x8xf32> to vector<256x8xf32>
    %36 = arith.addf %33, %35 : vector<256x8xf32>
    %c16_i32_7 = arith.constant 16 : i32
    %37 = tpu.dynamic_rotate %36 by %c16_i32_7 dim 0 : vector<256x8xf32>, i32 -> vector<256x8xf32>
    %c240_i32_8 = arith.constant 240 : i32
    %38 = tpu.dynamic_rotate %36 by %c240_i32_8 dim 0 : vector<256x8xf32>, i32 -> vector<256x8xf32>
    %39 = vector.shape_cast %20 : vector<256x1xi1> to vector<256x1xi1>
    %40 = vector.broadcast %39 : vector<256x1xi1> to vector<256x8xi1>
    %41 = arith.select %40, %38, %37 : vector<256x8xi1>, vector<256x8xf32>
    %42 = vector.shape_cast %22 : vector<256x1xi1> to vector<256x1xi1>
    %43 = vector.broadcast %42 : vector<256x1xi1> to vector<256x8xi1>
    %44 = arith.select %43, %37, %38 : vector<256x8xi1>, vector<256x8xf32>
    %45 = tpu.concatenate %41, %36, %44 in 1 : vector<256x8xf32>, vector<256x8xf32>, vector<256x8xf32> -> vector<256x24xf32>
    %c0_9 = arith.constant 0 : index
    %c0_10 = arith.constant 0 : index
    %46 = vector.load %arg4[%c0_9, %c0_10] : memref<24x16xf32, #tpu.memory_space<vmem>>, vector<24x16xf32>
    %cst_11 = arith.constant dense<0.000000e+00> : vector<256x16xf32>
    %47 = tpu.matmul %45, %46, %cst_11 {dimension_numbers = #tpu.dot_dimension_numbers<[1], [0], [0], [1], [0, 0, 1, 1], [], []>} : vector<256x24xf32>, vector<24x16xf32>, vector<256x16xf32> -> vector<256x16xf32>
    %c0_12 = arith.constant 0 : index
    %c0_13 = arith.constant 0 : index
    %48 = vector.load %arg5[%c0_12, %c0_13] : memref<1x16xf32, #tpu.memory_space<vmem>>, vector<1x16xf32>
    %49 = vector.broadcast %48 : vector<1x16xf32> to vector<256x16xf32>
    %50 = arith.addf %47, %49 : vector<256x16xf32>
    %cst_14 = arith.constant 0.000000e+00 : f32
    %51 = vector.broadcast %cst_14 : f32 to vector<256x16xf32>
    %52 = arith.maximumf %50, %51 : vector<256x16xf32>
    %53 = vector.extract_strided_slice %52 {offsets = [0, 0], sizes = [16, 16], strides = [1, 1]} : vector<256x16xf32> to vector<16x16xf32>
    %54 = vector.extract_strided_slice %52 {offsets = [16, 0], sizes = [16, 16], strides = [1, 1]} : vector<256x16xf32> to vector<16x16xf32>
    %55 = arith.maximumf %53, %54 : vector<16x16xf32>
    %56 = vector.extract_strided_slice %52 {offsets = [32, 0], sizes = [16, 16], strides = [1, 1]} : vector<256x16xf32> to vector<16x16xf32>
    %57 = arith.maximumf %55, %56 : vector<16x16xf32>
    %58 = vector.extract_strided_slice %52 {offsets = [48, 0], sizes = [16, 16], strides = [1, 1]} : vector<256x16xf32> to vector<16x16xf32>
    %59 = arith.maximumf %57, %58 : vector<16x16xf32>
    %60 = vector.extract_strided_slice %52 {offsets = [64, 0], sizes = [16, 16], strides = [1, 1]} : vector<256x16xf32> to vector<16x16xf32>
    %61 = arith.maximumf %59, %60 : vector<16x16xf32>
    %62 = vector.extract_strided_slice %52 {offsets = [80, 0], sizes = [16, 16], strides = [1, 1]} : vector<256x16xf32> to vector<16x16xf32>
    %63 = arith.maximumf %61, %62 : vector<16x16xf32>
    %64 = vector.extract_strided_slice %52 {offsets = [96, 0], sizes = [16, 16], strides = [1, 1]} : vector<256x16xf32> to vector<16x16xf32>
    %65 = arith.maximumf %63, %64 : vector<16x16xf32>
    %66 = vector.extract_strided_slice %52 {offsets = [112, 0], sizes = [16, 16], strides = [1, 1]} : vector<256x16xf32> to vector<16x16xf32>
    %67 = arith.maximumf %65, %66 : vector<16x16xf32>
    %68 = vector.extract_strided_slice %52 {offsets = [128, 0], sizes = [16, 16], strides = [1, 1]} : vector<256x16xf32> to vector<16x16xf32>
    %69 = arith.maximumf %67, %68 : vector<16x16xf32>
    %70 = vector.extract_strided_slice %52 {offsets = [144, 0], sizes = [16, 16], strides = [1, 1]} : vector<256x16xf32> to vector<16x16xf32>
    %71 = arith.maximumf %69, %70 : vector<16x16xf32>
    %72 = vector.extract_strided_slice %52 {offsets = [160, 0], sizes = [16, 16], strides = [1, 1]} : vector<256x16xf32> to vector<16x16xf32>
    %73 = arith.maximumf %71, %72 : vector<16x16xf32>
    %74 = vector.extract_strided_slice %52 {offsets = [176, 0], sizes = [16, 16], strides = [1, 1]} : vector<256x16xf32> to vector<16x16xf32>
    %75 = arith.maximumf %73, %74 : vector<16x16xf32>
    %76 = vector.extract_strided_slice %52 {offsets = [192, 0], sizes = [16, 16], strides = [1, 1]} : vector<256x16xf32> to vector<16x16xf32>
    %77 = arith.maximumf %75, %76 : vector<16x16xf32>
    %78 = vector.extract_strided_slice %52 {offsets = [208, 0], sizes = [16, 16], strides = [1, 1]} : vector<256x16xf32> to vector<16x16xf32>
    %79 = arith.maximumf %77, %78 : vector<16x16xf32>
    %80 = vector.extract_strided_slice %52 {offsets = [224, 0], sizes = [16, 16], strides = [1, 1]} : vector<256x16xf32> to vector<16x16xf32>
    %81 = arith.maximumf %79, %80 : vector<16x16xf32>
    %82 = vector.extract_strided_slice %52 {offsets = [240, 0], sizes = [16, 16], strides = [1, 1]} : vector<256x16xf32> to vector<16x16xf32>
    %83 = arith.maximumf %81, %82 : vector<16x16xf32>
    %c0_15 = arith.constant 0 : index
    %c0_16 = arith.constant 0 : index
    %84 = vector.load %arg6[%c0_15, %c0_16] : memref<16x256xf32, #tpu.memory_space<vmem>>, vector<16x256xf32>
    %cst_17 = arith.constant dense<0.000000e+00> : vector<16x256xf32>
    %85 = tpu.matmul %83, %84, %cst_17 {dimension_numbers = #tpu.dot_dimension_numbers<[1], [0], [0], [1], [0, 0, 1, 1], [], []>} : vector<16x16xf32>, vector<16x256xf32>, vector<16x256xf32> -> vector<16x256xf32>
    %c0_18 = arith.constant 0 : index
    %c0_19 = arith.constant 0 : index
    %86 = vector.load %arg7[%c0_18, %c0_19] : memref<1x256xf32, #tpu.memory_space<vmem>>, vector<1x256xf32>
    %87 = vector.broadcast %86 : vector<1x256xf32> to vector<16x256xf32>
    %88 = arith.addf %85, %87 : vector<16x256xf32>
    %cst_20 = arith.constant 0.000000e+00 : f32
    %89 = vector.broadcast %cst_20 : f32 to vector<16x256xf32>
    %90 = arith.maximumf %88, %89 : vector<16x256xf32>
    %c0_21 = arith.constant 0 : index
    %c0_22 = arith.constant 0 : index
    %91 = vector.load %arg8[%c0_21, %c0_22] : memref<256x128xf32, #tpu.memory_space<vmem>>, vector<256x128xf32>
    %cst_23 = arith.constant dense<0.000000e+00> : vector<16x128xf32>
    %92 = tpu.matmul %90, %91, %cst_23 {dimension_numbers = #tpu.dot_dimension_numbers<[1], [0], [0], [1], [0, 0, 1, 1], [], []>} : vector<16x256xf32>, vector<256x128xf32>, vector<16x128xf32> -> vector<16x128xf32>
    %c0_24 = arith.constant 0 : index
    %c0_25 = arith.constant 0 : index
    %93 = vector.load %arg9[%c0_24, %c0_25] : memref<1x128xf32, #tpu.memory_space<vmem>>, vector<1x128xf32>
    %94 = vector.broadcast %93 : vector<1x128xf32> to vector<16x128xf32>
    %95 = arith.addf %92, %94 : vector<16x128xf32>
    %c0_26 = arith.constant 0 : index
    %c0_27 = arith.constant 0 : index
    %96 = vector.load %arg10[%c0_26, %c0_27] : memref<16x128xf32, #tpu.memory_space<vmem>>, vector<16x128xf32>
    tpu.vector_store %arg10[%c0_26, %c0_27], %95 {strides = array<i32>} : memref<16x128xf32, #tpu.memory_space<vmem>>, vector<16x128xf32>,
    return
  }
  func.func @transform_0(%arg0: i32) -> (i32, i32) {
    %c0_i32 = arith.constant 0 : i32
    %c0_i32_0 = arith.constant 0 : i32
    return %arg0, %c0_i32 : i32, i32
  }
  func.func @transform_1(%arg0: i32) -> (i32, i32) {
    %c0_i32 = arith.constant 0 : i32
    %c0_i32_0 = arith.constant 0 : i32
    %c0_i32_1 = arith.constant 0 : i32
    return %c0_i32, %c0_i32_0 : i32, i32
  }
  func.func @transform_2(%arg0: i32) -> (i32, i32) {
    %c0_i32 = arith.constant 0 : i32
    %c0_i32_0 = arith.constant 0 : i32
    %c0_i32_1 = arith.constant 0 : i32
    return %c0_i32, %c0_i32_0 : i32, i32
  }
  func.func @transform_3(%arg0: i32) -> (i32, i32) {
    %c0_i32 = arith.constant 0 : i32
    %c0_i32_0 = arith.constant 0 : i32
    %c0_i32_1 = arith.constant 0 : i32
    return %c0_i32, %c0_i32_0 : i32, i32
  }
  func.func @transform_4(%arg0: i32) -> (i32, i32) {
    %c0_i32 = arith.constant 0 : i32
    %c0_i32_0 = arith.constant 0 : i32
    %c0_i32_1 = arith.constant 0 : i32
    return %c0_i32, %c0_i32_0 : i32, i32
  }
  func.func @transform_5(%arg0: i32) -> (i32, i32) {
    %c0_i32 = arith.constant 0 : i32
    %c0_i32_0 = arith.constant 0 : i32
    %c0_i32_1 = arith.constant 0 : i32
    return %c0_i32, %c0_i32_0 : i32, i32
  }
  func.func @transform_6(%arg0: i32) -> (i32, i32) {
    %c0_i32 = arith.constant 0 : i32
    %c0_i32_0 = arith.constant 0 : i32
    %c0_i32_1 = arith.constant 0 : i32
    return %c0_i32, %c0_i32_0 : i32, i32
  }
  func.func @transform_7(%arg0: i32) -> (i32, i32) {
    %c0_i32 = arith.constant 0 : i32
    %c0_i32_0 = arith.constant 0 : i32
    %c0_i32_1 = arith.constant 0 : i32
    return %c0_i32, %c0_i32_0 : i32, i32
  }
  func.func @transform_8(%arg0: i32) -> (i32, i32) {
    %c0_i32 = arith.constant 0 : i32
    %c0_i32_0 = arith.constant 0 : i32
    %c0_i32_1 = arith.constant 0 : i32
    return %c0_i32, %c0_i32_0 : i32, i32
  }
  func.func @transform_9(%arg0: i32) -> (i32, i32) {
    %c0_i32 = arith.constant 0 : i32
    %c0_i32_0 = arith.constant 0 : i32
    return %arg0, %c0_i32 : i32, i32
  }
}

</mosaic_0001>

<bundles_post_ra>
// kernel: tpu_custom_call.1
= control target key start
LH: loop header
LB: loop body
LE: loop exit
PB: predicated region body
PF: predicated region fallthrough
CT: control target
= control target key end

     0   :  { %14 = vsyncpa [#allocation3], 0  ;;  %s3870_s0 = inlined_call_operand.vmem [shape: f32[32,64], index: 0, kind: input, shape index: {}]   ;;  %s3871_s1 = inlined_call_operand.vmem [shape: f32[12,8], index: 1, kind: input, shape index: {}]   ;;  %s3872_s2 = inlined_call_operand.vmem [shape: f32[1,8], index: 2, kind: input, shape index: {}]   ;;  %s3873_s3 = inlined_call_operand.vmem [shape: f32[24,16], index: 3, kind: input, shape index: {}]   ;;  %s3874_s4 = inlined_call_operand.vmem [shape: f32[1,16], index: 4, kind: input, shape index: {}]   ;;  %s3875_s5 = inlined_call_operand.vmem [shape: f32[16,256], index: 5, kind: input, shape index: {}]   ;;  %s3876_s6 = inlined_call_operand.vmem [shape: f32[1,256], index: 6, kind: input, shape index: {}]   ;;  %s3877_s7 = inlined_call_operand.hbm [shape: f32[256,128], index: 7, kind: input, shape index: {}]   ;;  %s3878_s8 = inlined_call_operand.vmem [shape: f32[1,128], index: 8, kind: input, shape index: {}]   ;;  %s3879_s9 = inlined_call_operand.hbm [shape: f32[32,128], index: 9, kind: output, shape index: {}]  }
   0x1   :  { %15 = vsyncpa [#allocation4], 0 }
   0x2   :  { %17 = vsyncpa [#allocation4 + $0x1], 0  ;;  %s2979_s30 = smov 0   ;;  %s2981_s10 = smov 0  }
   0x3   :  { %s2983_s11 = smov 0   ;;  %s2985_s12 = smov 0  }
   0x4 LB: > { %s3000_s13 = sadd.s32 4294967295, %s2903_s12   ;;  %s2443_s14 = sadd.s32 4294967294, %s2903_s12   ;;  %s2903_s12 = sphi %s2985_s12, %s3887_s12   ;;  %s2899_s11 = sphi %s2983_s11, %s3886_s11   ;;  %s2895_s10 = sphi %s2981_s10, %s3885_s10   ;;  %s2891_s30 = sphi %s2979_s30, %s3884_s30  }
   0x5   : > { %s3004_s15 = sadd.s32 1, %s2903_s12   ;;  %s224_s16 = sadd.s32 1, %s2899_s11 }
   0x6   : > { %s221_s17 = ssub.s32 %s2903_s12, %s3004_s15  ;;  %p234_p0 = scmp.ne.s32.totalorder %s2899_s11, %s2895_s10 }
   0x7   : > { %p222_p1 = scmp.eq.s32.totalorder %s221_s17, 0  ;;  %p235_p2 = scmp.eq.s32.totalorder %s3000_s13, 1 }
   0x8   : > { %p240_p3 = scmp.ne.s32.totalorder %s2895_s10, %s2891_s30  ;;  %p241_p4 = scmp.eq.s32.totalorder %s2443_s14, 1 }
   0x9   : > { %s3015_s18 = scalar_select %p222_p1, %s2899_s11, %s224_s16  }
   0xa   : > { %p3017_p5 = por %p235_p2, %p234_p0  ;;  %p3021_p6 = por %p241_p4, %p240_p3 }
   0xb   : > { %p2444_p7 = scmp.ge.s32.totalorder %s2903_s12, 1  ;;  %p248_p8 = scmp.lt.s32.totalorder %s2903_s12, 3 }
   0xc   : > { %s3881_s20 = scalar_select %p3021_p6, 1, 0 }
   0xd   : > { %p2755_p9 = scmp.eq.s32.totalorder %s3000_s13, 0  ;;  %p3028_p10 = pnand %p2444_p7, %p248_p8 }
   0xe   : > { %s2905_s22 = smov [#allocation2]  }
   0xf   : > { %s278_s23 = sshll.u32 %s2905_s22, 4  ;;  %p2747_p11 = pneg %p3028_p10  ;;  %s279_s23 = int_to_ptr.vmem [resolvable:$true] %s278_s23 }
  0x10   : > { %s2824_s24 = scalar_lea.vmem %s279_s23, 4096  ;;  %p2832_p3 = scmp.lt.s32.totalorder %s279_s23, %s279_s23 }
  0x11   : > { %p2748_p12 = pnand %p2755_p9, %p2747_p11  ;;  %p2825_p0 = scmp.ne.s32.totalorder %s279_s23, %s2824_s24 }
  0x12   : > { %p2833_p4 = scmp.lt.s32.totalorder %s2824_s24, %s2824_s24 }
  0x13   : > { %p2815_p13 = pneg %p2748_p12 }
  0x14   : > { %p2834_p6 = por %p2833_p4, %p2832_p3 }
  0x15   : > { %p2827_p1 = pnand %p2825_p0, %p2815_p13 }
  0x17   : > { %p2828_p2 = pneg %p2827_p1 }
  0x19   : > { %p2835_p7 = pnand %p2834_p6, %p2828_p2 }
  0x1b   : > { %2838 = shalt.err (!%p2835_p7)
}
  0x1c   : > { %s2906_s25 = smov 128   ;;  %s2907_s26 = smov 8  }
  0x1d   : > { %2750 = dma.hbm_to_vmem [thread:$0]  (!%p2748_p12), %s3877_s7, 4096, %s279_s23, [#allocation3], %s2906_s25, %s2906_s25, %s2907_s26  }
  0x1e   : > { %306 = sbr.rel (%p3028_p10) target bundleno = 1338 (0x53a), region = 56 }
  0x23   : > { %2882 = dma.done.wait (%p2755_p9), [#allocation3], 4096  }
  0x24   : > { %2884 = vsyncadd (%p2755_p9), [#allocation3], 4294963200  ;;  %s2450_s29 = sshll.u32 %s3000_s13, 1  ;;  %s2908_s23 = smov 120   ;;  %v1023_v2 = vld [vmem:[%s3871_s1 + $0x8] sm:$0xf] }
  0x25   : > { %p343_p8 = scmp.lt.s32.totalorder %s2450_s29, 3  ;;  %s2909_s21 = smov 124   ;;  %vm1128_vm0 = vcmask 1043456   ;;  %v1022_v3 = vld [vmem:[%s3871_s1] sm:$0xff]  ;;  %vm956_vm1 = vcmask 31744   ;;  %vm989_vm2 = vcmask 64512  }
  0x26   : > { %s2910_s24 = smov 116   ;;  %s2911_s25 = smov 112   ;;  %2635 = vmatprep.subr.msk.mxu0 %vm1128_vm0, %v1023_v2  ;;  %vm1031_vm3 = vcmask 97280   ;;  %vm1709_vm4 = vcmask 130048   ;;  %vm1752_vm5 = vcmask 195584  }
  0x27   : > { %s3889_s29 = smov (!%p343_p8, %s2450_s29), 3  ;;  %s2912_s26 = smov 108   ;;  %2636 = vmatpush3.msk.msra.mxu0 %vm1128_vm0, %v1023_v2 }
  0x28   : > { %s2451_s14 = sshll.u32 %s3889_s29, 3  ;;  %s2913_s27 = smov 104   ;;  %2637 = vmatprep.subr.mxu0 %v1022_v3 }
  0x29   : > { %s346_s22 = scalar_lea.vmem %s3870_s0, %s2451_s14  ;;  %s2914_s28 = smov 100   ;;  %2638 = vmatpush3.msra.mxu0 %v1022_v3 }
  0x2a   : > { %v3049_v0 = vld [vmem:[%s346_s22] sm:$0xff]  ;;  %v3053_v1 = vld [vmem:[%s346_s22 + $0x8] sm:$0xff]  ;;  %s2915_s29 = smov 96   ;;  %s2916_s14 = smov 92  }
  0x2b   : > { %359 = vrot.lane.b32.xlu1 %v3049_v0, %s2908_s23  ;;  %353 = vrot.lane.b32.xlu0 %v3049_v0, %s2909_s21  ;;  %s2917_s16 = smov 88   ;;  %s2918_s17 = smov 84  }
  0x2c   : > { %s2919_s22 = smov 80  }
  0x2f   : > { %361 = vrot.lane.b32.xlu1 %v3053_v1, %s2908_s23  ;;  %355 = vrot.lane.b32.xlu0 %v3053_v1, %s2909_s21  ;;  %s2920_s23 = smov 76   ;;  %s2921_s21 = smov 72  }
  0x33   : > { %367 = vrot.lane.b32.xlu1 %v3053_v1, %s2910_s24  ;;  %365 = vrot.lane.b32.xlu0 %v3049_v0, %s2910_s24  ;;  %s2922_s24 = smov 68  }
  0x37   : > { %373 = vrot.lane.b32.xlu1 %v3053_v1, %s2911_s25  ;;  %371 = vrot.lane.b32.xlu0 %v3049_v0, %s2911_s25  ;;  %s2923_s25 = smov 4  }
  0x3b   : > { %379 = vrot.lane.b32.xlu1 %v3053_v1, %s2912_s26  ;;  %377 = vrot.lane.b32.xlu0 %v3049_v0, %s2912_s26 }
  0x3f   : > { %385 = vrot.lane.b32.xlu1 %v3053_v1, %s2913_s27  ;;  %383 = vrot.lane.b32.xlu0 %v3049_v0, %s2913_s27  ;;  %s2925_s27 = smov 16  }
  0x43   : > { %391 = vrot.lane.b32.xlu1 %v3053_v1, %s2914_s28  ;;  %389 = vrot.lane.b32.xlu0 %v3049_v0, %s2914_s28 }
  0x47   : > { %397 = vrot.lane.b32.xlu1 %v3053_v1, %s2915_s29  ;;  %395 = vrot.lane.b32.xlu0 %v3049_v0, %s2915_s29  ;;  %s339_s29 = sand.u32 1, %s2895_s10  }
  0x48   : > { %s3829_s28 = scalar_lea.sflag [#allocation4], %s339_s29 }
  0x4b   : > { %403 = vrot.lane.b32.xlu1 %v3053_v1, %s2916_s14  ;;  %401 = vrot.lane.b32.xlu0 %v3049_v0, %s2916_s14  ;;  %s2924_s14 = smov 8  }
  0x4f   : > { %409 = vrot.lane.b32.xlu1 %v3053_v1, %s2917_s16  ;;  %407 = vrot.lane.b32.xlu0 %v3049_v0, %s2917_s16  ;;  %s2449_s16 = sshll.u32 %s339_s29, 4 }
  0x53   : > { %415 = vrot.lane.b32.xlu1 %v3053_v1, %s2918_s17  ;;  %413 = vrot.lane.b32.xlu0 %v3049_v0, %s2918_s17 }
  0x57   : > { %421 = vrot.lane.b32.xlu1 %v3053_v1, %s2919_s22  ;;  %419 = vrot.lane.b32.xlu0 %v3049_v0, %s2919_s22 }
  0x5b   : > { %427 = vrot.lane.b32.xlu1 %v3053_v1, %s2920_s23  ;;  %425 = vrot.lane.b32.xlu0 %v3049_v0, %s2920_s23  ;;  %s341_s23 = scalar_lea.vmem [#allocation5], %s2449_s16 }
  0x5f   : > { %433 = vrot.lane.b32.xlu1 %v3053_v1, %s2921_s21  ;;  %431 = vrot.lane.b32.xlu0 %v3049_v0, %s2921_s21  ;;  %s2369_s21 = sshll.u32 %s341_s23, 4  ;;  %s3822_s21 = int_to_ptr.vmem [resolvable:$true] %s2369_s21 }
  0x60   : > { %s2839_s16 = scalar_lea.vmem %s3822_s21, 256 }
  0x61   : > { %p2840_p6 = scmp.ne.s32.totalorder %s3822_s21, %s2839_s16 }
  0x63   : > { %439 = vrot.lane.b32.xlu1 %v3053_v1, %s2922_s24  ;;  %437 = vrot.lane.b32.xlu0 %v3049_v0, %s2922_s24  ;;  %s2527_s24 = sshll.u32 %s3000_s13, 8  ;;  %p2841_p9 = pnand %p2840_p6, %p3017_p5 }
  0x64   : > { %s2927_s13 = smov [#allocation5]  }
  0x65   : > { %p2842_p10 = pneg %p2841_p9  ;;  %s2843_s17 = sshll.u32 %s2927_s13, 4  ;;  %s2844_s17 = int_to_ptr.vmem [resolvable:$false] %s2843_s17 }
  0x66   : > { %s2845_s22 = scalar_lea.vmem %s2844_s17, 512  ;;  %p2846_p11 = scmp.lt.s32.totalorder %s3822_s21, %s2844_s17 }
  0x67   : > { %734 = vrot.lane.b32.xlu1 %v3053_v1, %s2923_s25  ;;  %732 = vrot.lane.b32.xlu0 %v3049_v0, %s2923_s25  ;;  %p2847_p12 = scmp.lt.s32.totalorder %s2845_s22, %s2839_s16 }
  0x69   : > { %p2848_p13 = por %p2847_p12, %p2846_p11 }
  0x6b   : > { %p2849_p0 = pnand %p2848_p13, %p2842_p10 }
  0x9d   : > { %v3093_v4 = vpop.permute.xlu0 %353  ;;  %v3103_v6 = vpop.permute.xlu1 %359 }
  0x9e   : > { %860 = vrot.lane.b32.xlu0 %v3093_v4, %s2924_s14 }
  0xa1   : > { %v3097_v5 = vpop.permute.xlu0 %355  ;;  %v3109_v7 = vpop.permute.xlu1 %361 }
  0xa2   : > { %736 = vrot.lane.b32.xlu0 %v3093_v4, %s2923_s25  ;;  %862 = vrot.lane.b32.xlu1 %v3097_v5, %s2924_s14 }
  0xa5   : > { %v3115_v8 = vpop.permute.xlu0 %365  ;;  %v3121_v9 = vpop.permute.xlu1 %367 }
  0xa6   : > { %864 = vrot.lane.b32.xlu0 %v3103_v6, %s2924_s14  ;;  %738 = vrot.lane.b32.xlu1 %v3097_v5, %s2923_s25 }
  0xa9   : > { %v3127_v10 = vpop.permute.xlu0 %371  ;;  %v3133_v11 = vpop.permute.xlu1 %373 }
  0xaa   : > { %740 = vrot.lane.b32.xlu0 %v3103_v6, %s2923_s25  ;;  %866 = vrot.lane.b32.xlu1 %v3109_v7, %s2924_s14 }
  0xad   : > { %v3139_v12 = vpop.permute.xlu0 %377  ;;  %v3145_v13 = vpop.permute.xlu1 %379 }
  0xae   : > { %742 = vrot.lane.b32.xlu1 %v3109_v7, %s2923_s25  ;;  %868 = vrot.lane.b32.xlu0 %v3115_v8, %s2924_s14 }
  0xb1   : > { %v3151_v14 = vpop.permute.xlu0 %383  ;;  %v3157_v15 = vpop.permute.xlu1 %385 }
  0xb2   : > { %870 = vrot.lane.b32.xlu1 %v3121_v9, %s2924_s14  ;;  %744 = vrot.lane.b32.xlu0 %v3115_v8, %s2923_s25 }
  0xb5   : > { %v3163_v16 = vpop.permute.xlu0 %389  ;;  %v3169_v17 = vpop.permute.xlu1 %391 }
  0xb6   : > { %746 = vrot.lane.b32.xlu1 %v3121_v9, %s2923_s25  ;;  %872 = vrot.lane.b32.xlu0 %v3127_v10, %s2924_s14 }
  0xb9   : > { %v3175_v18 = vpop.permute.xlu0 %395  ;;  %v3181_v19 = vpop.permute.xlu1 %397 }
  0xba   : > { %874 = vrot.lane.b32.xlu1 %v3133_v11, %s2924_s14  ;;  %748 = vrot.lane.b32.xlu0 %v3127_v10, %s2923_s25 }
  0xbd   : > { %v3187_v20 = vpop.permute.xlu0 %401  ;;  %v3193_v21 = vpop.permute.xlu1 %403 }
  0xbe   : > { %750 = vrot.lane.b32.xlu1 %v3133_v11, %s2923_s25  ;;  %876 = vrot.lane.b32.xlu0 %v3139_v12, %s2924_s14 }
  0xc1   : > { %v3199_v22 = vpop.permute.xlu0 %407  ;;  %v3205_v23 = vpop.permute.xlu1 %409 }
  0xc2   : > { %878 = vrot.lane.b32.xlu1 %v3145_v13, %s2924_s14  ;;  %752 = vrot.lane.b32.xlu0 %v3139_v12, %s2923_s25 }
  0xc5   : > { %v3211_v24 = vpop.permute.xlu0 %413  ;;  %v3217_v25 = vpop.permute.xlu1 %415 }
  0xc6   : > { %754 = vrot.lane.b32.xlu1 %v3145_v13, %s2923_s25  ;;  %880 = vrot.lane.b32.xlu0 %v3151_v14, %s2924_s14 }
  0xc9   : > { %v3223_v26 = vpop.permute.xlu0 %419  ;;  %v3229_v27 = vpop.permute.xlu1 %421 }
  0xca   : > { %882 = vrot.lane.b32.xlu1 %v3157_v15, %s2924_s14  ;;  %756 = vrot.lane.b32.xlu0 %v3151_v14, %s2923_s25 }
  0xcd   : > { %v3231_v28 = vpop.permute.xlu0 %425  ;;  %v3237_v29 = vpop.permute.xlu1 %427 }
  0xce   : > { %758 = vrot.lane.b32.xlu1 %v3157_v15, %s2923_s25  ;;  %884 = vrot.lane.b32.xlu0 %v3163_v16, %s2924_s14 }
  0xd1   : > { %v3243_v30 = vpop.permute.xlu0 %431  ;;  %v3249_v31 = vpop.permute.xlu1 %433 }
  0xd2   : > { %886 = vrot.lane.b32.xlu1 %v3169_v17, %s2924_s14  ;;  %760 = vrot.lane.b32.xlu0 %v3163_v16, %s2923_s25 }
  0xd5   : > { %v438_v32 = vpop.permute.xlu0 %437  ;;  %v440_v33 = vpop.permute.xlu1 %439 }
  0xd6   : > { %762 = vrot.lane.b32.xlu1 %v3169_v17, %s2923_s25  ;;  %888 = vrot.lane.b32.xlu0 %v3175_v18, %s2924_s14 }
  0xd9   : > { %v733_v34 = vpop.permute.xlu0 %732  ;;  %v735_v35 = vpop.permute.xlu1 %734 }
  0xda   : > { %890 = vrot.lane.b32.xlu1 %v3181_v19, %s2924_s14  ;;  %764 = vrot.lane.b32.xlu0 %v3175_v18, %s2923_s25  ;;  %v957_v36 = vsel %vm956_vm1, %v3093_v4, %v733_v34  ;;  %v958_v39 = vsel %vm956_vm1, %v3097_v5, %v735_v35 }
  0xde   : > { %766 = vrot.lane.b32.xlu1 %v3181_v19, %s2923_s25  ;;  %892 = vrot.lane.b32.xlu0 %v3187_v20, %s2924_s14 }
  0xe2   : > { %894 = vrot.lane.b32.xlu1 %v3193_v21, %s2924_s14  ;;  %768 = vrot.lane.b32.xlu0 %v3187_v20, %s2923_s25 }
  0xe6   : > { %770 = vrot.lane.b32.xlu1 %v3193_v21, %s2923_s25  ;;  %896 = vrot.lane.b32.xlu0 %v3199_v22, %s2924_s14 }
  0xea   : > { %898 = vrot.lane.b32.xlu1 %v3205_v23, %s2924_s14  ;;  %772 = vrot.lane.b32.xlu0 %v3199_v22, %s2923_s25 }
  0xee   : > { %774 = vrot.lane.b32.xlu1 %v3205_v23, %s2923_s25  ;;  %900 = vrot.lane.b32.xlu0 %v3211_v24, %s2924_s14 }
  0xf2   : > { %902 = vrot.lane.b32.xlu1 %v3217_v25, %s2924_s14  ;;  %776 = vrot.lane.b32.xlu0 %v3211_v24, %s2923_s25 }
  0xf6   : > { %778 = vrot.lane.b32.xlu1 %v3217_v25, %s2923_s25  ;;  %904 = vrot.lane.b32.xlu0 %v3223_v26, %s2924_s14 }
  0xfa   : > { %906 = vrot.lane.b32.xlu1 %v3229_v27, %s2924_s14  ;;  %780 = vrot.lane.b32.xlu0 %v3223_v26, %s2923_s25 }
  0xfe   : > { %782 = vrot.lane.b32.xlu1 %v3229_v27, %s2923_s25  ;;  %908 = vrot.lane.b32.xlu0 %v3231_v28, %s2924_s14 }
 0x102   : > { %910 = vrot.lane.b32.xlu1 %v3237_v29, %s2924_s14  ;;  %784 = vrot.lane.b32.xlu0 %v3231_v28, %s2923_s25 }
 0x106   : > { %786 = vrot.lane.b32.xlu1 %v3237_v29, %s2923_s25  ;;  %912 = vrot.lane.b32.xlu0 %v3243_v30, %s2924_s14 }
 0x10a   : > { %914 = vrot.lane.b32.xlu1 %v3249_v31, %s2924_s14  ;;  %788 = vrot.lane.b32.xlu0 %v3243_v30, %s2923_s25 }
 0x10e   : > { %790 = vrot.lane.b32.xlu1 %v3249_v31, %s2923_s25  ;;  %916 = vrot.lane.b32.xlu0 %v438_v32, %s2924_s14 }
 0x110   : > { %v861_v37 = vpop.permute.xlu0 %860 }
 0x111   : > { %v990_v38 = vsel %vm989_vm2, %v957_v36, %v861_v37 }
 0x112   : > { %918 = vrot.lane.b32.xlu1 %v440_v33, %s2924_s14  ;;  %792 = vrot.lane.b32.xlu0 %v438_v32, %s2923_s25 }
 0x113   : > { %2639 = vmatprep.mubr.msk.f32.mxu0 %vm1031_vm3, %v990_v38 }
 0x114   : > { %v863_v40 = vpop.permute.xlu1 %862  ;;  %v737_v41 = vpop.permute.xlu0 %736 }
 0x115   : > { %v991_v42 = vsel %vm989_vm2, %v958_v39, %v863_v40  ;;  %v959_v43 = vsel %vm956_vm1, %v3049_v0, %v737_v41 }
 0x116   : > { %794 = vrot.lane.b32.xlu1 %v440_v33, %s2923_s25  ;;  %920 = vrot.lane.b32.xlu0 %v3243_v30, %s2924_s14 }
 0x117   : > { %2640 = vmatmul.mubr.msk.f32.vlgmr.msra.gmra.mxu0 %vm1031_vm3, %v991_v42 }
 0x118   : > { %v739_v44 = vpop.permute.xlu1 %738  ;;  %v865_v45 = vpop.permute.xlu0 %864 }
 0x119   : > { %v992_v46 = vsel %vm989_vm2, %v959_v43, %v865_v45  ;;  %v960_v47 = vsel %vm956_vm1, %v3053_v1, %v739_v44 }
 0x11a   : > { %922 = vrot.lane.b32.xlu1 %v3249_v31, %s2924_s14  ;;  %2642 = vmatprep.mubr.msk.f32.mxu0 %vm1031_vm3, %v992_v46 }
 0x11c   : > { %v867_v48 = vpop.permute.xlu1 %866  ;;  %v741_v49 = vpop.permute.xlu0 %740 }
 0x11d   : > { %v993_v50 = vsel %vm989_vm2, %v960_v47, %v867_v48  ;;  %v961_v51 = vsel %vm956_vm1, %v3093_v4, %v741_v49 }
 0x11e   : > { %2643 = vmatmul.mubr.msk.f32.gmra.mxu0 %vm1031_vm3, %v993_v50 }
 0x120   : > { %v743_v52 = vpop.permute.xlu1 %742  ;;  %v869_v53 = vpop.permute.xlu0 %868 }
 0x121   : > { %v994_v54 = vsel %vm989_vm2, %v961_v51, %v869_v53  ;;  %v962_v55 = vsel %vm956_vm1, %v3097_v5, %v743_v52 }
 0x122   : > { %2645 = vmatprep.mubr.msk.f32.mxu0 %vm1031_vm3, %v994_v54 }
 0x124   : > { %v871_v56 = vpop.permute.xlu1 %870  ;;  %v745_v57 = vpop.permute.xlu0 %744 }
 0x125   : > { %v995_v58 = vsel %vm989_vm2, %v962_v55, %v871_v56  ;;  %v963_v59 = vsel %vm956_vm1, %v3103_v6, %v745_v57 }
 0x126   : > { %2646 = vmatmul.mubr.msk.f32.gmra.mxu0 %vm1031_vm3, %v995_v58 }
 0x128   : > { %v747_v60 = vpop.permute.xlu1 %746  ;;  %v873_v61 = vpop.permute.xlu0 %872 }
 0x129   : > { %v996_v62 = vsel %vm989_vm2, %v963_v59, %v873_v61  ;;  %v964_v63 = vsel %vm956_vm1, %v3109_v7, %v747_v60 }
 0x12a   : > { %2648 = vmatprep.mubr.msk.f32.mxu0 %vm1031_vm3, %v996_v62 }
 0x12c   : > { %v875_v0 = vpop.permute.xlu1 %874  ;;  %v749_v1 = vpop.permute.xlu0 %748 }
 0x12d   : > { %v997_v2 = vsel %vm989_vm2, %v964_v63, %v875_v0  ;;  %v965_v3 = vsel %vm956_vm1, %v3115_v8, %v749_v1 }
 0x12e   : > { %2649 = vmatmul.mubr.msk.f32.gmra.mxu0 %vm1031_vm3, %v997_v2 }
 0x130   : > { %v751_v4 = vpop.permute.xlu1 %750  ;;  %v877_v5 = vpop.permute.xlu0 %876 }
 0x131   : > { %v998_v6 = vsel %vm989_vm2, %v965_v3, %v877_v5  ;;  %v966_v32 = vsel %vm956_vm1, %v3121_v9, %v751_v4 }
 0x132   : > { %2651 = vmatprep.mubr.msk.f32.mxu0 %vm1031_vm3, %v998_v6 }
 0x134   : > { %v879_v33 = vpop.permute.xlu1 %878  ;;  %v753_v7 = vpop.permute.xlu0 %752 }
 0x135   : > { %v999_v34 = vsel %vm989_vm2, %v966_v32, %v879_v33  ;;  %v967_v35 = vsel %vm956_vm1, %v3127_v10, %v753_v7 }
 0x136   : > { %2652 = vmatmul.mubr.msk.f32.gmra.mxu0 %vm1031_vm3, %v999_v34 }
 0x138   : > { %v755_v36 = vpop.permute.xlu1 %754  ;;  %v881_v8 = vpop.permute.xlu0 %880 }
 0x139   : > { %v1000_v37 = vsel %vm989_vm2, %v967_v35, %v881_v8  ;;  %v968_v38 = vsel %vm956_vm1, %v3133_v11, %v755_v36 }
 0x13a   : > { %2654 = vmatprep.mubr.msk.f32.mxu0 %vm1031_vm3, %v1000_v37 }
 0x13c   : > { %v883_v39 = vpop.permute.xlu1 %882  ;;  %v757_v9 = vpop.permute.xlu0 %756 }
 0x13d   : > { %v1001_v40 = vsel %vm989_vm2, %v968_v38, %v883_v39  ;;  %v969_v41 = vsel %vm956_vm1, %v3139_v12, %v757_v9 }
 0x13e   : > { %2655 = vmatmul.mubr.msk.f32.gmra.mxu0 %vm1031_vm3, %v1001_v40 }
 0x140   : > { %v759_v42 = vpop.permute.xlu1 %758  ;;  %v885_v10 = vpop.permute.xlu0 %884 }
 0x141   : > { %v1002_v43 = vsel %vm989_vm2, %v969_v41, %v885_v10  ;;  %v970_v44 = vsel %vm956_vm1, %v3145_v13, %v759_v42 }
 0x142   : > { %2657 = vmatprep.mubr.msk.f32.mxu0 %vm1031_vm3, %v1002_v43 }
 0x144   : > { %v887_v45 = vpop.permute.xlu1 %886  ;;  %v761_v11 = vpop.permute.xlu0 %760 }
 0x145   : > { %v1003_v46 = vsel %vm989_vm2, %v970_v44, %v887_v45  ;;  %v971_v47 = vsel %vm956_vm1, %v3151_v14, %v761_v11 }
 0x146   : > { %2658 = vmatmul.mubr.msk.f32.gmra.mxu0 %vm1031_vm3, %v1003_v46 }
 0x148   : > { %v763_v48 = vpop.permute.xlu1 %762  ;;  %v889_v12 = vpop.permute.xlu0 %888 }
 0x149   : > { %v1004_v49 = vsel %vm989_vm2, %v971_v47, %v889_v12  ;;  %v972_v50 = vsel %vm956_vm1, %v3157_v15, %v763_v48 }
 0x14a   : > { %2660 = vmatprep.mubr.msk.f32.mxu0 %vm1031_vm3, %v1004_v49 }
 0x14c   : > { %v891_v51 = vpop.permute.xlu1 %890  ;;  %v765_v13 = vpop.permute.xlu0 %764 }
 0x14d   : > { %v1005_v52 = vsel %vm989_vm2, %v972_v50, %v891_v51  ;;  %v973_v53 = vsel %vm956_vm1, %v3163_v16, %v765_v13 }
 0x14e   : > { %2661 = vmatmul.mubr.msk.f32.gmra.mxu0 %vm1031_vm3, %v1005_v52 }
 0x150   : > { %v767_v54 = vpop.permute.xlu1 %766  ;;  %v893_v14 = vpop.permute.xlu0 %892 }
 0x151   : > { %v1006_v55 = vsel %vm989_vm2, %v973_v53, %v893_v14  ;;  %v974_v56 = vsel %vm956_vm1, %v3169_v17, %v767_v54  ;;  %v1744_v54 = vld [vmem:[%s3873_s3 + $0x10] sm:$0xff]  ;;  %v3406_v14 = vld [vmem:[%s3872_s2] ss:$0 sm:$0xff] }
 0x152   : > { %2663 = vmatprep.mubr.msk.f32.mxu0 %vm1031_vm3, %v1006_v55  ;;  %2687 = vmatprep.subr.mxu1 %v1744_v54 }
 0x153   : > { %2688 = vmatpush3.msra.mxu1 %v1744_v54 }
 0x154   : > { %v895_v57 = vpop.permute.xlu1 %894  ;;  %v769_v15 = vpop.permute.xlu0 %768 }
 0x155   : > { %v1007_v58 = vsel %vm989_vm2, %v974_v56, %v895_v57  ;;  %v975_v59 = vsel %vm956_vm1, %v3175_v18, %v769_v15 }
 0x156   : > { %2664 = vmatmul.mubr.msk.f32.gmra.mxu0 %vm1031_vm3, %v1007_v58 }
 0x158   : > { %v771_v60 = vpop.permute.xlu1 %770  ;;  %v897_v16 = vpop.permute.xlu0 %896 }
 0x159   : > { %v1008_v61 = vsel %vm989_vm2, %v975_v59, %v897_v16  ;;  %v976_v62 = vsel %vm956_vm1, %v3181_v19, %v771_v60 }
 0x15a   : > { %2666 = vmatprep.mubr.msk.f32.mxu0 %vm1031_vm3, %v1008_v61 }
 0x15c   : > { %v899_v63 = vpop.permute.xlu1 %898  ;;  %v773_v17 = vpop.permute.xlu0 %772 }
 0x15d   : > { %v1009_v0 = vsel %vm989_vm2, %v976_v62, %v899_v63  ;;  %v977_v1 = vsel %vm956_vm1, %v3187_v20, %v773_v17 }
 0x15e   : > { %2667 = vmatmul.mubr.msk.f32.gmra.mxu0 %vm1031_vm3, %v1009_v0 }
 0x160   : > { %v775_v2 = vpop.permute.xlu1 %774  ;;  %v901_v18 = vpop.permute.xlu0 %900 }
 0x161   : > { %v1010_v3 = vsel %vm989_vm2, %v977_v1, %v901_v18  ;;  %v978_v4 = vsel %vm956_vm1, %v3193_v21, %v775_v2 }
 0x162   : > { %2669 = vmatprep.mubr.msk.f32.mxu0 %vm1031_vm3, %v1010_v3 }
 0x164   : > { %v903_v5 = vpop.permute.xlu1 %902  ;;  %v777_v19 = vpop.permute.xlu0 %776 }
 0x165   : > { %v1011_v6 = vsel %vm989_vm2, %v978_v4, %v903_v5  ;;  %v979_v32 = vsel %vm956_vm1, %v3199_v22, %v777_v19 }
 0x166   : > { %2670 = vmatmul.mubr.msk.f32.gmra.mxu0 %vm1031_vm3, %v1011_v6 }
 0x168   : > { %v779_v33 = vpop.permute.xlu1 %778  ;;  %v905_v20 = vpop.permute.xlu0 %904 }
 0x169   : > { %v1012_v7 = vsel %vm989_vm2, %v979_v32, %v905_v20  ;;  %v980_v34 = vsel %vm956_vm1, %v3205_v23, %v779_v33 }
 0x16a   : > { %2672 = vmatprep.mubr.msk.f32.mxu0 %vm1031_vm3, %v1012_v7 }
 0x16c   : > { %v907_v35 = vpop.permute.xlu1 %906  ;;  %v781_v21 = vpop.permute.xlu0 %780 }
 0x16d   : > { %v1013_v36 = vsel %vm989_vm2, %v980_v34, %v907_v35  ;;  %v981_v8 = vsel %vm956_vm1, %v3211_v24, %v781_v21 }
 0x16e   : > { %2673 = vmatmul.mubr.msk.f32.gmra.mxu0 %vm1031_vm3, %v1013_v36 }
 0x170   : > { %v783_v37 = vpop.permute.xlu1 %782  ;;  %v909_v22 = vpop.permute.xlu0 %908 }
 0x171   : > { %v1014_v38 = vsel %vm989_vm2, %v981_v8, %v909_v22  ;;  %v982_v39 = vsel %vm956_vm1, %v3217_v25, %v783_v37 }
 0x172   : > { %2675 = vmatprep.mubr.msk.f32.mxu0 %vm1031_vm3, %v1014_v38 }
 0x174   : > { %v911_v9 = vpop.permute.xlu1 %910  ;;  %v785_v23 = vpop.permute.xlu0 %784 }
 0x175   : > { %v1015_v40 = vsel %vm989_vm2, %v982_v39, %v911_v9  ;;  %v983_v41 = vsel %vm956_vm1, %v3223_v26, %v785_v23 }
 0x176   : > { %2676 = vmatmul.mubr.msk.f32.gmra.mxu0 %vm1031_vm3, %v1015_v40 }
 0x178   : > { %v787_v42 = vpop.permute.xlu1 %786  ;;  %v913_v24 = vpop.permute.xlu0 %912 }
 0x179   : > { %v1016_v10 = vsel %vm989_vm2, %v983_v41, %v913_v24  ;;  %v984_v43 = vsel %vm956_vm1, %v3229_v27, %v787_v42 }
 0x17a   : > { %2678 = vmatprep.mubr.msk.f32.mxu0 %vm1031_vm3, %v1016_v10 }
 0x17c   : > { %v915_v44 = vpop.permute.xlu1 %914  ;;  %v789_v25 = vpop.permute.xlu0 %788 }
 0x17d   : > { %v1017_v45 = vsel %vm989_vm2, %v984_v43, %v915_v44  ;;  %v985_v11 = vsel %vm956_vm1, %v3231_v28, %v789_v25 }
 0x17e   : > { %2679 = vmatmul.mubr.msk.f32.gmra.mxu0 %vm1031_vm3, %v1017_v45 }
 0x180   : > { %v791_v46 = vpop.permute.xlu1 %790  ;;  %v917_v26 = vpop.permute.xlu0 %916 }
 0x181   : > { %v1018_v47 = vsel %vm989_vm2, %v985_v11, %v917_v26  ;;  %v986_v48 = vsel %vm956_vm1, %v3237_v29, %v791_v46 }
 0x182   : > { %2681 = vmatprep.mubr.msk.f32.mxu0 %vm1031_vm3, %v1018_v47 }
 0x184   : > { %v919_v12 = vpop.permute.xlu1 %918  ;;  %v793_v27 = vpop.permute.xlu0 %792 }
 0x185   : > { %v1019_v49 = vsel %vm989_vm2, %v986_v48, %v919_v12  ;;  %v987_v50 = vsel %vm956_vm1, %v3243_v30, %v793_v27  ;;  %v1743_v30 = vld [vmem:[%s3873_s3 + $0x8] sm:$0xff] }
 0x186   : > { %2682 = vmatmul.mubr.msk.f32.gmra.mxu0 %vm1031_vm3, %v1019_v49  ;;  %2689 = vmatprep.subr.mxu1 %v1743_v30 }
 0x187   : > { %2690 = vmatpush3.msra.mxu1 %v1743_v30 }
 0x188   : > { %v795_v51 = vpop.permute.xlu1 %794  ;;  %v921_v28 = vpop.permute.xlu0 %920 }
 0x189   : > { %v1020_v13 = vsel %vm989_vm2, %v987_v50, %v921_v28  ;;  %v988_v52 = vsel %vm956_vm1, %v3249_v31, %v795_v51  ;;  %v1742_v31 = vld [vmem:[%s3873_s3] sm:$0xff] }
 0x18a   : > { %2684 = vmatprep.mubr.msk.f32.mxu0 %vm1031_vm3, %v1020_v13  ;;  %2691 = vmatprep.subr.mxu1 %v1742_v31 }
 0x18b   : > { %2692 = vmatpush3.msra.mxu1 %v1742_v31 }
 0x18c   : > { %v923_v53 = vpop.permute.xlu1 %922 }
 0x18d   : > { %v1021_v29 = vsel %vm989_vm2, %v988_v52, %v923_v53 }
 0x18e   : > { %2685 = vmatmul.mubr.msk.f32.gmra.mxu0 %vm1031_vm3, %v1021_v29 }
 0x1d7   : > { %v2641_v55 = vpop.f32.mrf.mxu0 }
 0x1d8   : > { %v3412_v56 = vadd.f32 %v2641_v55, %v3406_v14 }
 0x1d9   : > { %v1198_v57 = vpop.f32.mrf.mxu0 }
 0x1da   : > { %v3415_v15 = vadd.f32 %v3406_v14, %v1198_v57  ;;  %1455 = vrot.lane.b32.xlu1 %v3412_v56, %s2924_s14 }
 0x1dc   : > { %1453 = vrot.lane.b32.xlu0 %v3415_v15, %s2924_s14 }
 0x1de   : > { %v2644_v58 = vpop.f32.mrf.mxu0 }
 0x1df   : > { %v3422_v59 = vadd.f32 %v2644_v58, %v3406_v14 }
 0x1e0   : > { %v1208_v60 = vpop.f32.mrf.mxu0 }
 0x1e1   : > { %v3425_v16 = vadd.f32 %v3406_v14, %v1208_v60  ;;  %1583 = vrot.lane.b32.xlu1 %v3422_v59, %s2925_s27 }
 0x1e3   : > { %1581 = vrot.lane.b32.xlu0 %v3425_v16, %s2925_s27 }
 0x1e5   : > { %1459 = vrot.lane.b32.xlu1 %v3422_v59, %s2924_s14 }
 0x1e6   : > { %v2647_v61 = vpop.f32.mrf.mxu0 }
 0x1e7   : > { %v3434_v62 = vadd.f32 %v2647_v61, %v3406_v14  ;;  %1457 = vrot.lane.b32.xlu0 %v3425_v16, %s2924_s14 }
 0x1e8   : > { %v1218_v63 = vpop.f32.mrf.mxu0 }
 0x1e9   : > { %v3439_v17 = vadd.f32 %v3406_v14, %v1218_v63  ;;  %1587 = vrot.lane.b32.xlu1 %v3434_v62, %s2925_s27 }
 0x1eb   : > { %1585 = vrot.lane.b32.xlu0 %v3439_v17, %s2925_s27 }
 0x1ed   : > { %1463 = vrot.lane.b32.xlu1 %v3434_v62, %s2924_s14 }
 0x1ee   : > { %v2650_v0 = vpop.f32.mrf.mxu0 }
 0x1ef   : > { %v3448_v1 = vadd.f32 %v2650_v0, %v3406_v14  ;;  %1461 = vrot.lane.b32.xlu0 %v3439_v17, %s2924_s14 }
 0x1f0   : > { %v1228_v2 = vpop.f32.mrf.mxu0 }
 0x1f1   : > { %v3453_v18 = vadd.f32 %v3406_v14, %v1228_v2  ;;  %1591 = vrot.lane.b32.xlu1 %v3448_v1, %s2925_s27 }
 0x1f3   : > { %1589 = vrot.lane.b32.xlu0 %v3453_v18, %s2925_s27 }
 0x1f5   : > { %1467 = vrot.lane.b32.xlu1 %v3448_v1, %s2924_s14 }
 0x1f6   : > { %v2653_v3 = vpop.f32.mrf.mxu0 }
 0x1f7   : > { %v3462_v4 = vadd.f32 %v2653_v3, %v3406_v14  ;;  %1465 = vrot.lane.b32.xlu0 %v3453_v18, %s2924_s14 }
 0x1f8   : > { %v1238_v5 = vpop.f32.mrf.mxu0 }
 0x1f9   : > { %v3467_v19 = vadd.f32 %v3406_v14, %v1238_v5  ;;  %1595 = vrot.lane.b32.xlu1 %v3462_v4, %s2925_s27 }
 0x1fb   : > { %1593 = vrot.lane.b32.xlu0 %v3467_v19, %s2925_s27 }
 0x1fd   : > { %1471 = vrot.lane.b32.xlu1 %v3462_v4, %s2924_s14 }
 0x1fe   : > { %v2656_v6 = vpop.f32.mrf.mxu0 }
 0x1ff   : > { %v3476_v32 = vadd.f32 %v2656_v6, %v3406_v14  ;;  %1469 = vrot.lane.b32.xlu0 %v3467_v19, %s2924_s14 }
 0x200   : > { %v1248_v33 = vpop.f32.mrf.mxu0 }
 0x201   : > { %v3481_v20 = vadd.f32 %v3406_v14, %v1248_v33  ;;  %1599 = vrot.lane.b32.xlu1 %v3476_v32, %s2925_s27 }
 0x203   : > { %1597 = vrot.lane.b32.xlu0 %v3481_v20, %s2925_s27 }
 0x205   : > { %1475 = vrot.lane.b32.xlu1 %v3476_v32, %s2924_s14 }
 0x206   : > { %v2659_v7 = vpop.f32.mrf.mxu0 }
 0x207   : > { %v3490_v34 = vadd.f32 %v2659_v7, %v3406_v14  ;;  %1473 = vrot.lane.b32.xlu0 %v3481_v20, %s2924_s14 }
 0x208   : > { %v1258_v35 = vpop.f32.mrf.mxu0 }
 0x209   : > { %v3495_v21 = vadd.f32 %v3406_v14, %v1258_v35  ;;  %1603 = vrot.lane.b32.xlu1 %v3490_v34, %s2925_s27 }
 0x20b   : > { %1601 = vrot.lane.b32.xlu0 %v3495_v21, %s2925_s27 }
 0x20d   : > { %1479 = vrot.lane.b32.xlu1 %v3490_v34, %s2924_s14 }
 0x20e   : > { %v2662_v36 = vpop.f32.mrf.mxu0 }
 0x20f   : > { %v3504_v8 = vadd.f32 %v2662_v36, %v3406_v14  ;;  %1477 = vrot.lane.b32.xlu0 %v3495_v21, %s2924_s14 }
 0x210   : > { %v1268_v37 = vpop.f32.mrf.mxu0 }
 0x211   : > { %v3509_v22 = vadd.f32 %v3406_v14, %v1268_v37  ;;  %1607 = vrot.lane.b32.xlu1 %v3504_v8, %s2925_s27 }
 0x213   : > { %1605 = vrot.lane.b32.xlu0 %v3509_v22, %s2925_s27 }
 0x215   : > { %1483 = vrot.lane.b32.xlu1 %v3504_v8, %s2924_s14 }
 0x216   : > { %v2665_v38 = vpop.f32.mrf.mxu0 }
 0x217   : > { %v3518_v39 = vadd.f32 %v2665_v38, %v3406_v14  ;;  %1481 = vrot.lane.b32.xlu0 %v3509_v22, %s2924_s14 }
 0x218   : > { %v1278_v9 = vpop.f32.mrf.mxu0 }
 0x219   : > { %v3523_v23 = vadd.f32 %v3406_v14, %v1278_v9  ;;  %1611 = vrot.lane.b32.xlu1 %v3518_v39, %s2925_s27 }
 0x21b   : > { %1609 = vrot.lane.b32.xlu0 %v3523_v23, %s2925_s27 }
 0x21d   : > { %1487 = vrot.lane.b32.xlu1 %v3518_v39, %s2924_s14 }
 0x21e   : > { %v2668_v40 = vpop.f32.mrf.mxu0 }
 0x21f   : > { %v3532_v41 = vadd.f32 %v2668_v40, %v3406_v14  ;;  %1485 = vrot.lane.b32.xlu0 %v3523_v23, %s2924_s14 }
 0x220   : > { %v1288_v42 = vpop.f32.mrf.mxu0 }
 0x221   : > { %v3537_v24 = vadd.f32 %v3406_v14, %v1288_v42  ;;  %1615 = vrot.lane.b32.xlu1 %v3532_v41, %s2925_s27 }
 0x223   : > { %1613 = vrot.lane.b32.xlu0 %v3537_v24, %s2925_s27 }
 0x225   : > { %1491 = vrot.lane.b32.xlu1 %v3532_v41, %s2924_s14 }
 0x226   : > { %v2671_v10 = vpop.f32.mrf.mxu0 }
 0x227   : > { %v3546_v43 = vadd.f32 %v2671_v10, %v3406_v14  ;;  %1489 = vrot.lane.b32.xlu0 %v3537_v24, %s2924_s14 }
 0x228   : > { %v1298_v44 = vpop.f32.mrf.mxu0 }
 0x229   : > { %v3551_v25 = vadd.f32 %v3406_v14, %v1298_v44  ;;  %1619 = vrot.lane.b32.xlu1 %v3546_v43, %s2925_s27 }
 0x22b   : > { %1617 = vrot.lane.b32.xlu0 %v3551_v25, %s2925_s27 }
 0x22d   : > { %1495 = vrot.lane.b32.xlu1 %v3546_v43, %s2924_s14 }
 0x22e   : > { %v2674_v45 = vpop.f32.mrf.mxu0 }
 0x22f   : > { %v3560_v11 = vadd.f32 %v2674_v45, %v3406_v14  ;;  %1493 = vrot.lane.b32.xlu0 %v3551_v25, %s2924_s14 }
 0x230   : > { %v1308_v46 = vpop.f32.mrf.mxu0 }
 0x231   : > { %v3565_v26 = vadd.f32 %v3406_v14, %v1308_v46  ;;  %1623 = vrot.lane.b32.xlu1 %v3560_v11, %s2925_s27 }
 0x233   : > { %1621 = vrot.lane.b32.xlu0 %v3565_v26, %s2925_s27 }
 0x235   : > { %1499 = vrot.lane.b32.xlu1 %v3560_v11, %s2924_s14 }
 0x236   : > { %v2677_v47 = vpop.f32.mrf.mxu0 }
 0x237   : > { %v3574_v48 = vadd.f32 %v2677_v47, %v3406_v14  ;;  %1497 = vrot.lane.b32.xlu0 %v3565_v26, %s2924_s14 }
 0x238   : > { %v1318_v12 = vpop.f32.mrf.mxu0 }
 0x239   : > { %v3579_v27 = vadd.f32 %v3406_v14, %v1318_v12  ;;  %1627 = vrot.lane.b32.xlu1 %v3574_v48, %s2925_s27 }
 0x23b   : > { %1625 = vrot.lane.b32.xlu0 %v3579_v27, %s2925_s27 }
 0x23d   : > { %1503 = vrot.lane.b32.xlu1 %v3574_v48, %s2924_s14 }
 0x23e   : > { %v2680_v49 = vpop.f32.mrf.mxu0 }
 0x23f   : > { %v3588_v50 = vadd.f32 %v2680_v49, %v3406_v14  ;;  %1501 = vrot.lane.b32.xlu0 %v3579_v27, %s2924_s14 }
 0x240   : > { %v1328_v51 = vpop.f32.mrf.mxu0 }
 0x241   : > { %v3593_v28 = vadd.f32 %v3406_v14, %v1328_v51  ;;  %1631 = vrot.lane.b32.xlu1 %v3588_v50, %s2925_s27 }
 0x243   : > { %1629 = vrot.lane.b32.xlu0 %v3593_v28, %s2925_s27 }
 0x245   : > { %1507 = vrot.lane.b32.xlu1 %v3588_v50, %s2924_s14 }
 0x246   : > { %v2683_v13 = vpop.f32.mrf.mxu0 }
 0x247   : > { %v3602_v52 = vadd.f32 %v2683_v13, %v3406_v14  ;;  %1505 = vrot.lane.b32.xlu0 %v3593_v28, %s2924_s14 }
 0x248   : > { %v1338_v53 = vpop.f32.mrf.mxu0 }
 0x249   : > { %v3607_v29 = vadd.f32 %v3406_v14, %v1338_v53  ;;  %1635 = vrot.lane.b32.xlu1 %v3602_v52, %s2925_s27 }
 0x24b   : > { %1633 = vrot.lane.b32.xlu0 %v3607_v29, %s2925_s27 }
 0x24c   : > { %v1456_v30 = vpop.permute.xlu1 %1455 }
 0x24d   : > { %1511 = vrot.lane.b32.xlu1 %v3602_v52, %s2924_s14  ;;  %v1678_v0 = vsel %vm989_vm2, %v3422_v59, %v1456_v30 }
 0x24e   : > { %v2686_v54 = vpop.f32.mrf.mxu0  ;;  %v1454_v57 = vpop.permute.xlu0 %1453 }
 0x24f   : > { %v1354_v31 = vadd.f32 %v2686_v54, %v3406_v14  ;;  %1509 = vrot.lane.b32.xlu0 %v3607_v29, %s2924_s14  ;;  %v1677_v61 = vsel %vm989_vm2, %v3425_v16, %v1454_v57 }
 0x250   : > { %v1348_v55 = vpop.f32.mrf.mxu0 }
 0x251   : > { %v1349_v58 = vadd.f32 %v3406_v14, %v1348_v55  ;;  %1639 = vrot.lane.b32.xlu1 %v1354_v31, %s2925_s27 }
 0x253   : > { %v1584_v60 = vpop.permute.xlu1 %1583  ;;  %1637 = vrot.lane.b32.xlu0 %v1349_v58, %s2925_s27 }
 0x254   : > { %v1711_v14 = vsel %vm1709_vm4, %v1678_v0, %v1584_v60 }
 0x255   : > { %1515 = vrot.lane.b32.xlu1 %v1354_v31, %s2924_s14  ;;  %v1582_v63 = vpop.permute.xlu0 %1581 }
 0x256   : > { %v1710_v2 = vsel %vm1709_vm4, %v1677_v61, %v1582_v63 }
 0x257   : > { %v1460_v3 = vpop.permute.xlu1 %1459  ;;  %1513 = vrot.lane.b32.xlu0 %v1349_v58, %s2924_s14  ;;  %2693 = vmatprep.mubr.msk.f32.mxu1 %vm1752_vm5, %v1710_v2 }
 0x258   : > { %2694 = vmatmul.mubr.msk.f32.vlgmr.msra.gmra.mxu1 %vm1752_vm5, %v1711_v14  ;;  %v1680_v35 = vsel %vm989_vm2, %v3412_v56, %v1460_v3 }
 0x259   : > { %1643 = vrot.lane.b32.xlu1 %v3602_v52, %s2925_s27  ;;  %v1458_v5 = vpop.permute.xlu0 %1457 }
 0x25a   : > { %v1679_v33 = vsel %vm989_vm2, %v3415_v15, %v1458_v5 }
 0x25b   : > { %v1588_v6 = vpop.permute.xlu1 %1587  ;;  %1641 = vrot.lane.b32.xlu0 %v3607_v29, %s2925_s27  ;;  %s3827_s27 = scalar_lea.hbm %s3879_s9, %s2527_s24 }
 0x25c   : > { %v1713_v37 = vsel %vm1709_vm4, %v1680_v35, %v1588_v6 }
 0x25d   : > { %v1586_v7 = vpop.permute.xlu0 %1585 }
 0x25e   : > { %v1712_v36 = vsel %vm1709_vm4, %v1679_v33, %v1586_v7 }
 0x25f   : > { %v1464_v38 = vpop.permute.xlu1 %1463  ;;  %2696 = vmatprep.mubr.msk.f32.mxu1 %vm1752_vm5, %v1712_v36 }
 0x260   : > { %2697 = vmatmul.mubr.msk.f32.gmra.mxu1 %vm1752_vm5, %v1713_v37  ;;  %v1682_v15 = vsel %vm989_vm2, %v3422_v59, %v1464_v38 }
 0x261   : > { %v1462_v9 = vpop.permute.xlu0 %1461 }
 0x262   : > { %v1681_v42 = vsel %vm989_vm2, %v3425_v16, %v1462_v9 }
 0x263   : > { %v1592_v40 = vpop.permute.xlu1 %1591 }
 0x264   : > { %v1715_v44 = vsel %vm1709_vm4, %v1682_v15, %v1592_v40 }
 0x265   : > { %v1590_v10 = vpop.permute.xlu0 %1589 }
 0x266   : > { %v1714_v56 = vsel %vm1709_vm4, %v1681_v42, %v1590_v10 }
 0x267   : > { %v1468_v45 = vpop.permute.xlu1 %1467  ;;  %2699 = vmatprep.mubr.msk.f32.mxu1 %vm1752_vm5, %v1714_v56 }
 0x268   : > { %2700 = vmatmul.mubr.msk.f32.gmra.mxu1 %vm1752_vm5, %v1715_v44  ;;  %v1684_v16 = vsel %vm989_vm2, %v3434_v62, %v1468_v45 }
 0x269   : > { %v1466_v46 = vpop.permute.xlu0 %1465 }
 0x26a   : > { %v1683_v12 = vsel %vm989_vm2, %v3439_v17, %v1466_v46 }
 0x26b   : > { %v1596_v47 = vpop.permute.xlu1 %1595 }
 0x26c   : > { %v1717_v51 = vsel %vm1709_vm4, %v1684_v16, %v1596_v47 }
 0x26d   : > { %v1594_v49 = vpop.permute.xlu0 %1593 }
 0x26e   : > { %v1716_v59 = vsel %vm1709_vm4, %v1683_v12, %v1594_v49 }
 0x26f   : > { %v1472_v13 = vpop.permute.xlu1 %1471  ;;  %2702 = vmatprep.mubr.msk.f32.mxu1 %vm1752_vm5, %v1716_v59 }
 0x270   : > { %2703 = vmatmul.mubr.msk.f32.gmra.mxu1 %vm1752_vm5, %v1717_v51  ;;  %v1686_v17 = vsel %vm989_vm2, %v3448_v1, %v1472_v13 }
 0x271   : > { %v1470_v53 = vpop.permute.xlu0 %1469 }
 0x272   : > { %v1685_v30 = vsel %vm989_vm2, %v3453_v18, %v1470_v53 }
 0x273   : > { %v1600_v54 = vpop.permute.xlu1 %1599 }
 0x274   : > { %v1719_v55 = vsel %vm1709_vm4, %v1686_v17, %v1600_v54 }
 0x275   : > { %v1598_v31 = vpop.permute.xlu0 %1597 }
 0x276   : > { %v1718_v62 = vsel %vm1709_vm4, %v1685_v30, %v1598_v31 }
 0x277   : > { %v1476_v57 = vpop.permute.xlu1 %1475  ;;  %2705 = vmatprep.mubr.msk.f32.mxu1 %vm1752_vm5, %v1718_v62 }
 0x278   : > { %2706 = vmatmul.mubr.msk.f32.gmra.mxu1 %vm1752_vm5, %v1719_v55  ;;  %v1688_v18 = vsel %vm989_vm2, %v3462_v4, %v1476_v57 }
 0x279   : > { %v1474_v58 = vpop.permute.xlu0 %1473 }
 0x27a   : > { %v1687_v61 = vsel %vm989_vm2, %v3467_v19, %v1474_v58 }
 0x27b   : > { %v1604_v60 = vpop.permute.xlu1 %1603 }
 0x27c   : > { %v1721_v0 = vsel %vm1709_vm4, %v1688_v18, %v1604_v60 }
 0x27d   : > { %v1602_v63 = vpop.permute.xlu0 %1601 }
 0x27e   : > { %v1720_v1 = vsel %vm1709_vm4, %v1687_v61, %v1602_v63 }
 0x27f   : > { %v1480_v2 = vpop.permute.xlu1 %1479  ;;  %2708 = vmatprep.mubr.msk.f32.mxu1 %vm1752_vm5, %v1720_v1 }
 0x280   : > { %2709 = vmatmul.mubr.msk.f32.gmra.mxu1 %vm1752_vm5, %v1721_v0  ;;  %v1690_v19 = vsel %vm989_vm2, %v3476_v32, %v1480_v2 }
 0x281   : > { %v1478_v14 = vpop.permute.xlu0 %1477 }
 0x282   : > { %v1689_v5 = vsel %vm989_vm2, %v3481_v20, %v1478_v14 }
 0x283   : > { %v1608_v3 = vpop.permute.xlu1 %1607 }
 0x284   : > { %v1723_v33 = vsel %vm1709_vm4, %v1690_v19, %v1608_v3 }
 0x285   : > { %v1606_v6 = vpop.permute.xlu0 %1605 }
 0x286   : > { %v1722_v4 = vsel %vm1709_vm4, %v1689_v5, %v1606_v6 }
 0x287   : > { %v1484_v7 = vpop.permute.xlu1 %1483  ;;  %2711 = vmatprep.mubr.msk.f32.mxu1 %vm1752_vm5, %v1722_v4 }
 0x288   : > { %2712 = vmatmul.mubr.msk.f32.gmra.mxu1 %vm1752_vm5, %v1723_v33  ;;  %v1692_v20 = vsel %vm989_vm2, %v3490_v34, %v1484_v7 }
 0x289   : > { %v1482_v35 = vpop.permute.xlu0 %1481 }
 0x28a   : > { %v1691_v37 = vsel %vm989_vm2, %v3495_v21, %v1482_v35 }
 0x28b   : > { %v1612_v36 = vpop.permute.xlu1 %1611 }
 0x28c   : > { %v1725_v9 = vsel %vm1709_vm4, %v1692_v20, %v1612_v36 }
 0x28d   : > { %v1610_v38 = vpop.permute.xlu0 %1609 }
 0x28e   : > { %v1724_v32 = vsel %vm1709_vm4, %v1691_v37, %v1610_v38 }
 0x28f   : > { %v1488_v40 = vpop.permute.xlu1 %1487  ;;  %2714 = vmatprep.mubr.msk.f32.mxu1 %vm1752_vm5, %v1724_v32 }
 0x290   : > { %2715 = vmatmul.mubr.msk.f32.gmra.mxu1 %vm1752_vm5, %v1725_v9  ;;  %v1694_v21 = vsel %vm989_vm2, %v3504_v8, %v1488_v40 }
 0x291   : > { %v1486_v42 = vpop.permute.xlu0 %1485 }
 0x292   : > { %v1693_v15 = vsel %vm989_vm2, %v3509_v22, %v1486_v42 }
 0x293   : > { %v1616_v10 = vpop.permute.xlu1 %1615 }
 0x294   : > { %v1727_v44 = vsel %vm1709_vm4, %v1694_v21, %v1616_v10  ;;  %v2139_v10 = vld [vmem:[%s3875_s5 + $0x18] sm:$0xff] }
 0x295   : > { %v1614_v56 = vpop.permute.xlu0 %1613  ;;  %2186 = vmatprep.subr.mxu0 %v2139_v10  ;;  %v2270_v21 = vld [vmem:[#allocation2 + $0xf8] sm:$0xff] }
 0x296   : > { %v1726_v34 = vsel %vm1709_vm4, %v1693_v15, %v1614_v56  ;;  %v2136_v15 = vld [vmem:[%s3875_s5] sm:$0xff]  ;;  %v2926_v56 = vmov 0.0   ;;  %2597 = vmatprep.subr.mxu1 %v2270_v21 }
 0x297   : > { %v1492_v45 = vpop.permute.xlu1 %1491  ;;  %2717 = vmatprep.mubr.msk.f32.mxu1 %vm1752_vm5, %v1726_v34  ;;  %2222 = vmatprep.mubr.f32.mxu0 %v2926_v56  ;;  %v2254_v34 = vld [vmem:[#allocation2 + $0x78] sm:$0xff] }
 0x298   : > { %2718 = vmatmul.mubr.msk.f32.gmra.mxu1 %vm1752_vm5, %v1727_v44  ;;  %v1696_v22 = vsel %vm989_vm2, %v3518_v39, %v1492_v45  ;;  %v2269_v44 = vld [vmem:[#allocation2 + $0xf0] sm:$0xff] }
 0x299   : > { %v1490_v46 = vpop.permute.xlu0 %1489  ;;  %v2253_v45 = vld [vmem:[#allocation2 + $0x70] sm:$0xff]  ;;  %2598 = vmatpush3.msra.mxu1 %v2254_v34 }
 0x29a   : > { %v1695_v12 = vsel %vm989_vm2, %v3523_v23, %v1490_v46  ;;  %v2268_v46 = vld [vmem:[#allocation2 + $0xe8] sm:$0xff]  ;;  %2599 = vmatprep.subr.mxu1 %v2269_v44 }
 0x29b   : > { %v1620_v47 = vpop.permute.xlu1 %1619  ;;  %2600 = vmatpush3.msra.mxu1 %v2253_v45 }
 0x29c   : > { %v1729_v16 = vsel %vm1709_vm4, %v1696_v22, %v1620_v47  ;;  %v2252_v47 = vld [vmem:[#allocation2 + $0x68] sm:$0xff]  ;;  %2601 = vmatprep.subr.mxu1 %v2268_v46  ;;  %v2266_v22 = vld [vmem:[#allocation2 + $0xd8] sm:$0xff] }
 0x29d   : > { %v1618_v49 = vpop.permute.xlu0 %1617  ;;  %2602 = vmatpush3.msra.mxu1 %v2252_v47 }
 0x29e   : > { %v1728_v8 = vsel %vm1709_vm4, %v1695_v12, %v1618_v49  ;;  %v2267_v12 = vld [vmem:[#allocation2 + $0xe0] sm:$0xff] }
 0x29f   : > { %v1496_v59 = vpop.permute.xlu1 %1495  ;;  %2720 = vmatprep.mubr.msk.f32.mxu1 %vm1752_vm5, %v1728_v8  ;;  %v2251_v49 = vld [vmem:[#allocation2 + $0x60] sm:$0xff]  ;;  %2603 = vmatprep.subr.mxu1 %v2267_v12  ;;  %v2250_v8 = vld [vmem:[#allocation2 + $0x58] sm:$0xff] }
 0x2a0   : > { %2721 = vmatmul.mubr.msk.f32.gmra.mxu1 %vm1752_vm5, %v1729_v16  ;;  %v1698_v23 = vsel %vm989_vm2, %v3532_v41, %v1496_v59  ;;  %v2265_v16 = vld [vmem:[#allocation2 + $0xd0] sm:$0xff] }
 0x2a1   : > { %v1494_v51 = vpop.permute.xlu0 %1493  ;;  %2604 = vmatpush3.msra.mxu1 %v2251_v49  ;;  %v2249_v59 = vld [vmem:[#allocation2 + $0x50] sm:$0xff] }
 0x2a2   : > { %v1697_v53 = vsel %vm989_vm2, %v3537_v24, %v1494_v51  ;;  %2605 = vmatprep.subr.mxu1 %v2266_v22  ;;  %v2264_v51 = vld [vmem:[#allocation2 + $0xc8] sm:$0xff] }
 0x2a3   : > { %v1624_v13 = vpop.permute.xlu1 %1623  ;;  %2606 = vmatpush3.msra.mxu1 %v2250_v8 }
 0x2a4   : > { %v1731_v30 = vsel %vm1709_vm4, %v1698_v23, %v1624_v13  ;;  %2607 = vmatprep.subr.mxu1 %v2265_v16  ;;  %v2248_v13 = vld [vmem:[#allocation2 + $0x48] sm:$0xff]  ;;  %v2262_v23 = vld [vmem:[#allocation2 + $0xb8] sm:$0xff] }
 0x2a5   : > { %v1622_v54 = vpop.permute.xlu0 %1621  ;;  %2608 = vmatpush3.msra.mxu1 %v2249_v59 }
 0x2a6   : > { %v1730_v39 = vsel %vm1709_vm4, %v1697_v53, %v1622_v54  ;;  %v2263_v53 = vld [vmem:[#allocation2 + $0xc0] sm:$0xff]  ;;  %2609 = vmatprep.subr.mxu1 %v2264_v51 }
 0x2a7   : > { %v1500_v31 = vpop.permute.xlu1 %1499  ;;  %2723 = vmatprep.mubr.msk.f32.mxu1 %vm1752_vm5, %v1730_v39  ;;  %v2247_v54 = vld [vmem:[#allocation2 + $0x40] sm:$0xff]  ;;  %2610 = vmatpush3.msra.mxu1 %v2248_v13  ;;  %v2246_v39 = vld [vmem:[#allocation2 + $0x38] sm:$0xff] }
 0x2a8   : > { %2724 = vmatmul.mubr.msk.f32.gmra.mxu1 %vm1752_vm5, %v1731_v30  ;;  %v1700_v24 = vsel %vm989_vm2, %v3546_v43, %v1500_v31  ;;  %2611 = vmatprep.subr.mxu1 %v2263_v53  ;;  %v2261_v30 = vld [vmem:[#allocation2 + $0xb0] sm:$0xff] }
 0x2a9   : > { %v1498_v17 = vpop.permute.xlu0 %1497  ;;  %2612 = vmatpush3.msra.mxu1 %v2247_v54  ;;  %v2245_v31 = vld [vmem:[#allocation2 + $0x30] sm:$0xff] }
 0x2aa   : > { %v1699_v55 = vsel %vm989_vm2, %v3551_v25, %v1498_v17  ;;  %2613 = vmatprep.subr.mxu1 %v2262_v23  ;;  %v2260_v17 = vld [vmem:[#allocation2 + $0xa8] sm:$0xff] }
 0x2ab   : > { %v1628_v62 = vpop.permute.xlu1 %1627  ;;  %2614 = vmatpush3.msra.mxu1 %v2246_v39 }
 0x2ac   : > { %v1733_v58 = vsel %vm1709_vm4, %v1700_v24, %v1628_v62  ;;  %2615 = vmatprep.subr.mxu1 %v2261_v30  ;;  %v2244_v62 = vld [vmem:[#allocation2 + $0x28] sm:$0xff]  ;;  %v2258_v24 = vld [vmem:[#allocation2 + $0x98] sm:$0xff] }
 0x2ad   : > { %v1626_v57 = vpop.permute.xlu0 %1625  ;;  %2616 = vmatpush3.msra.mxu1 %v2245_v31 }
 0x2ae   : > { %v1732_v41 = vsel %vm1709_vm4, %v1699_v55, %v1626_v57  ;;  %v2259_v55 = vld [vmem:[#allocation2 + $0xa0] sm:$0xff]  ;;  %2617 = vmatprep.subr.mxu1 %v2260_v17 }
 0x2af   : > { %v1504_v60 = vpop.permute.xlu1 %1503  ;;  %2726 = vmatprep.mubr.msk.f32.mxu1 %vm1752_vm5, %v1732_v41  ;;  %v2243_v57 = vld [vmem:[#allocation2 + $0x20] sm:$0xff]  ;;  %2618 = vmatpush3.msra.mxu1 %v2244_v62 }
 0x2b0   : > { %2727 = vmatmul.mubr.msk.f32.gmra.mxu1 %vm1752_vm5, %v1733_v58  ;;  %v1702_v25 = vsel %vm989_vm2, %v3560_v11, %v1504_v60  ;;  %2619 = vmatprep.subr.mxu1 %v2259_v55  ;;  %v2242_v58 = vld [vmem:[#allocation2 + $0x18] sm:$0xff]  ;;  %v2257_v60 = vld [vmem:[#allocation2 + $0x90] sm:$0xff] }
 0x2b1   : > { %v1502_v61 = vpop.permute.xlu0 %1501  ;;  %2620 = vmatpush3.msra.mxu1 %v2243_v57 }
 0x2b2   : > { %v1701_v18 = vsel %vm989_vm2, %v3565_v26, %v1502_v61  ;;  %2621 = vmatprep.subr.mxu1 %v2258_v24  ;;  %v2241_v61 = vld [vmem:[#allocation2 + $0x10] sm:$0xff] }
 0x2b3   : > { %v1632_v63 = vpop.permute.xlu1 %1631  ;;  %2622 = vmatpush3.msra.mxu1 %v2242_v58 }
 0x2b4   : > { %v1735_v0 = vsel %vm1709_vm4, %v1702_v25, %v1632_v63  ;;  %v2256_v63 = vld [vmem:[#allocation2 + $0x88] sm:$0xff]  ;;  %2623 = vmatprep.subr.mxu1 %v2257_v60 }
 0x2b5   : > { %v1630_v1 = vpop.permute.xlu0 %1629  ;;  %2624 = vmatpush3.msra.mxu1 %v2241_v61 }
 0x2b6   : > { %v1734_v43 = vsel %vm1709_vm4, %v1701_v18, %v1630_v1  ;;  %2625 = vmatprep.subr.mxu1 %v2256_v63 }
 0x2b7   : > { %v1508_v2 = vpop.permute.xlu1 %1507  ;;  %2729 = vmatprep.mubr.msk.f32.mxu1 %vm1752_vm5, %v1734_v43 }
 0x2b8   : > { %2730 = vmatmul.mubr.msk.f32.gmra.mxu1 %vm1752_vm5, %v1735_v0  ;;  %v1704_v26 = vsel %vm989_vm2, %v3574_v48, %v1508_v2 }
 0x2b9   : > { %v1506_v14 = vpop.permute.xlu0 %1505 }
 0x2ba   : > { %v1703_v5 = vsel %vm989_vm2, %v3579_v27, %v1506_v14 }
 0x2bb   : > { %v1636_v3 = vpop.permute.xlu1 %1635 }
 0x2bc   : > { %v1737_v19 = vsel %vm1709_vm4, %v1704_v26, %v1636_v3 }
 0x2bd   : > { %v1634_v6 = vpop.permute.xlu0 %1633 }
 0x2be   : > { %v1736_v11 = vsel %vm1709_vm4, %v1703_v5, %v1634_v6 }
 0x2bf   : > { %v1512_v4 = vpop.permute.xlu1 %1511  ;;  %2732 = vmatprep.mubr.msk.f32.mxu1 %vm1752_vm5, %v1736_v11 }
 0x2c0   : > { %2733 = vmatmul.mubr.msk.f32.gmra.mxu1 %vm1752_vm5, %v1737_v19  ;;  %v1706_v27 = vsel %vm989_vm2, %v3588_v50, %v1512_v4 }
 0x2c1   : > { %v1510_v33 = vpop.permute.xlu0 %1509 }
 0x2c2   : > { %v1705_v35 = vsel %vm989_vm2, %v3593_v28, %v1510_v33 }
 0x2c3   : > { %v1640_v7 = vpop.permute.xlu1 %1639 }
 0x2c4   : > { %v1739_v37 = vsel %vm1709_vm4, %v1706_v27, %v1640_v7 }
 0x2c5   : > { %v1638_v36 = vpop.permute.xlu0 %1637 }
 0x2c6   : > { %v1738_v48 = vsel %vm1709_vm4, %v1705_v35, %v1638_v36 }
 0x2c7   : > { %v1516_v38 = vpop.permute.xlu1 %1515  ;;  %2735 = vmatprep.mubr.msk.f32.mxu1 %vm1752_vm5, %v1738_v48 }
 0x2c8   : > { %2736 = vmatmul.mubr.msk.f32.gmra.mxu1 %vm1752_vm5, %v1739_v37  ;;  %v1708_v28 = vsel %vm989_vm2, %v3602_v52, %v1516_v38  ;;  %v2137_v52 = vld [vmem:[%s3875_s5 + $0x8] sm:$0xff]  ;;  %v3773_v37 = vld [vmem:[%s3874_s4] ss:$0 sm:$0xff] }
 0x2c9   : > { %v1514_v20 = vpop.permute.xlu0 %1513 }
 0x2ca   : > { %v1707_v9 = vsel %vm989_vm2, %v3607_v29, %v1514_v20  ;;  %v2138_v29 = vld [vmem:[%s3875_s5 + $0x10] sm:$0xff] }
 0x2cb   : > { %v1644_v32 = vpop.permute.xlu1 %1643  ;;  %2187 = vmatpush1.msra.mxu0 %v2138_v29 }
 0x2cc   : > { %v1741_v42 = vsel %vm1709_vm4, %v1708_v28, %v1644_v32  ;;  %2188 = vmatprep.subr.mxu0 %v2137_v52 }
 0x2cd   : > { %v1642_v40 = vpop.permute.xlu0 %1641  ;;  %2189 = vmatpush1.msra.mxu0 %v2136_v15 }
 0x2ce   : > { %v1740_v50 = vsel %vm1709_vm4, %v1707_v9, %v1642_v40 }
 0x2cf   : > { %2738 = vmatprep.mubr.msk.f32.mxu1 %vm1752_vm5, %v1740_v50 }
 0x2d0   : > { %2739 = vmatmul.mubr.msk.f32.gmra.mxu1 %vm1752_vm5, %v1741_v42 }
 0x318   : > { %v2695_v41 = vpop.f32.mrf.mxu1 }
 0x319   : > { %v1921_v10 = vadd.f32 %v2695_v41, %v3773_v37 }
 0x31a   : > { %v1915_v18 = vpop.f32.mrf.mxu1 }
 0x31b   : > { %v1916_v32 = vadd.f32 %v3773_v37, %v1915_v18  ;;  %v2075_v49 = vmax.f32 %v1921_v10, 0.0 }
 0x31d   : > { %v2074_v52 = vmax.f32 %v1916_v32, 0.0 }
 0x320   : > { %v2698_v1 = vpop.f32.mrf.mxu1 }
 0x321   : > { %v1931_v40 = vadd.f32 %v2698_v1, %v3773_v37 }
 0x322   : > { %v1925_v25 = vpop.f32.mrf.mxu1 }
 0x323   : > { %v1926_v38 = vadd.f32 %v3773_v37, %v1925_v25  ;;  %v2077_v34 = vmax.f32 %v1931_v40, 0.0 }
 0x325   : > { %v2076_v50 = vmax.f32 %v1926_v38, 0.0  ;;  %v2107_v53 = vmax.f32 %v2075_v49, %v2077_v34 }
 0x327   : > { %v2106_v46 = vmax.f32 %v2074_v52, %v2076_v50 }
 0x328   : > { %v2701_v43 = vpop.f32.mrf.mxu1 }
 0x329   : > { %v1941_v29 = vadd.f32 %v2701_v43, %v3773_v37 }
 0x32a   : > { %v1935_v0 = vpop.f32.mrf.mxu1 }
 0x32b   : > { %v1936_v9 = vadd.f32 %v3773_v37, %v1935_v0  ;;  %v2079_v22 = vmax.f32 %v1941_v29, 0.0 }
 0x32d   : > { %v2078_v15 = vmax.f32 %v1936_v9, 0.0  ;;  %v2109_v17 = vmax.f32 %v2107_v53, %v2079_v22 }
 0x32f   : > { %v2108_v59 = vmax.f32 %v2106_v46, %v2078_v15 }
 0x330   : > { %v2704_v2 = vpop.f32.mrf.mxu1 }
 0x331   : > { %v1951_v44 = vadd.f32 %v2704_v2, %v3773_v37 }
 0x332   : > { %v1945_v14 = vpop.f32.mrf.mxu1 }
 0x333   : > { %v1946_v42 = vadd.f32 %v3773_v37, %v1945_v14  ;;  %v2081_v54 = vmax.f32 %v1951_v44, 0.0 }
 0x335   : > { %v2080_v47 = vmax.f32 %v1946_v42, 0.0  ;;  %v2111_v60 = vmax.f32 %v2109_v17, %v2081_v54 }
 0x337   : > { %v2110_v39 = vmax.f32 %v2108_v59, %v2080_v47 }
 0x338   : > { %v2707_v3 = vpop.f32.mrf.mxu1 }
 0x339   : > { %v1961_v8 = vadd.f32 %v2707_v3, %v3773_v37 }
 0x33a   : > { %v1955_v5 = vpop.f32.mrf.mxu1 }
 0x33b   : > { %v1956_v21 = vadd.f32 %v3773_v37, %v1955_v5  ;;  %v2083_v62 = vmax.f32 %v1961_v8, 0.0 }
 0x33d   : > { %v2082_v51 = vmax.f32 %v1956_v21, 0.0  ;;  %v2113_v0 = vmax.f32 %v2111_v60, %v2083_v62 }
 0x33f   : > { %v2112_v24 = vmax.f32 %v2110_v39, %v2082_v51 }
 0x340   : > { %v2710_v6 = vpop.f32.mrf.mxu1 }
 0x341   : > { %v1971_v23 = vadd.f32 %v2710_v6, %v3773_v37 }
 0x342   : > { %v1965_v26 = vpop.f32.mrf.mxu1 }
 0x343   : > { %v1966_v12 = vadd.f32 %v3773_v37, %v1965_v26  ;;  %v2085_v61 = vmax.f32 %v1971_v23, 0.0 }
 0x345   : > { %v2084_v30 = vmax.f32 %v1966_v12, 0.0  ;;  %v2115_v26 = vmax.f32 %v2113_v0, %v2085_v61 }
 0x347   : > { %v2114_v1 = vmax.f32 %v2112_v24, %v2084_v30 }
 0x348   : > { %v2713_v11 = vpop.f32.mrf.mxu1 }
 0x349   : > { %v1981_v55 = vadd.f32 %v2713_v11, %v3773_v37 }
 0x34a   : > { %v1975_v19 = vpop.f32.mrf.mxu1 }
 0x34b   : > { %v1976_v13 = vadd.f32 %v3773_v37, %v1975_v19  ;;  %v2087_v2 = vmax.f32 %v1981_v55, 0.0 }
 0x34d   : > { %v2086_v41 = vmax.f32 %v1976_v13, 0.0  ;;  %v2117_v32 = vmax.f32 %v2115_v26, %v2087_v2 }
 0x34f   : > { %v2116_v3 = vmax.f32 %v2114_v1, %v2086_v41  ;;  %v2240_v1 = vld [vmem:[#allocation2 + $0x8] sm:$0xff] }
 0x350   : > { %v2716_v4 = vpop.f32.mrf.mxu1  ;;  %2626 = vmatpush3.msra.mxu1 %v2240_v1 }
 0x351   : > { %v1991_v63 = vadd.f32 %v2716_v4, %v3773_v37 }
 0x352   : > { %v1985_v33 = vpop.f32.mrf.mxu1 }
 0x353   : > { %v1986_v31 = vadd.f32 %v3773_v37, %v1985_v33  ;;  %v2089_v11 = vmax.f32 %v1991_v63, 0.0 }
 0x355   : > { %v2088_v25 = vmax.f32 %v1986_v31, 0.0 }
 0x358   : > { %v2719_v7 = vpop.f32.mrf.mxu1 }
 0x359   : > { %v2001_v14 = vadd.f32 %v2719_v7, %v3773_v37 }
 0x35a   : > { %v1995_v35 = vpop.f32.mrf.mxu1 }
 0x35b   : > { %v1996_v58 = vadd.f32 %v3773_v37, %v1995_v35  ;;  %v2118_v35 = vmax.f32 %v2116_v3, %v2088_v25  ;;  %v2091_v9 = vmax.f32 %v2001_v14, 0.0  ;;  %v2255_v25 = vld [vmem:[#allocation2 + $0x80] sm:$0xff] }
 0x35c   : > { %2627 = vmatprep.subr.mxu1 %v2255_v25  ;;  %v2140_v14 = vld [vmem:[%s3876_s6] sm:$0x3] }
 0x35d   : > { %v2090_v5 = vmax.f32 %v1996_v58, 0.0 }
 0x35f   : > { %v2120_v7 = vmax.f32 %v2118_v35, %v2090_v5 }
 0x360   : > { %v2722_v36 = vpop.f32.mrf.mxu1 }
 0x361   : > { %v2011_v19 = vadd.f32 %v2722_v36, %v3773_v37 }
 0x362   : > { %v2005_v27 = vpop.f32.mrf.mxu1 }
 0x363   : > { %v2006_v43 = vadd.f32 %v3773_v37, %v2005_v27  ;;  %v2093_v10 = vmax.f32 %v2011_v19, 0.0 }
 0x365   : > { %v2092_v4 = vmax.f32 %v2006_v43, 0.0  ;;  %v2142_v43 = vlaneseq }
 0x367   : > { %v2122_v52 = vmax.f32 %v2120_v7, %v2092_v4  ;;  %v2143_v0 = vshrl.u32 %v2142_v43, 7 }
 0x368   : > { %v3768_v48 = vpop.f32.mrf.mxu1 }
 0x369   : > { %v2021_v27 = vadd.f32 %v3768_v48, %v3773_v37  ;;  %v2144_v2 = vsub.s32 0, %v2143_v0  ;;  %v2148_v3 = vsub.s32 1, %v2143_v0 }
 0x36a   : > { %v2015_v20 = vpop.f32.mrf.mxu1 }
 0x36b   : > { %v2016_v6 = vadd.f32 %v3773_v37, %v2015_v20  ;;  %v2119_v20 = vmax.f32 %v2117_v32, %v2089_v11  ;;  %v2095_v44 = vmax.f32 %v2021_v27, 0.0  ;;  %v2145_v5 = vrot.slane %v2140_v14, %v2144_v2 }
 0x36d   : > { %v2094_v50 = vmax.f32 %v2016_v6, 0.0  ;;  %v2121_v34 = vmax.f32 %v2119_v20, %v2091_v9  ;;  %v2149_v6 = vrot.slane %v2140_v14, %v2148_v3 }
 0x36f   : > { %v2123_v12 = vmax.f32 %v2121_v34, %v2093_v10 }
 0x370   : > { %v3779_v28 = vpop.f32.mrf.mxu1 }
 0x371   : > { %v2031_v36 = vadd.f32 %v3779_v28, %v3773_v37  ;;  %v2125_v28 = vmax.f32 %v2123_v12, %v2095_v44 }
 0x372   : > { %v2025_v45 = vpop.f32.mrf.mxu1 }
 0x373   : > { %v2026_v38 = vadd.f32 %v3773_v37, %v2025_v45  ;;  %v2124_v45 = vmax.f32 %v2122_v52, %v2094_v50  ;;  %v2097_v49 = vmax.f32 %v2031_v36, 0.0  ;;  %v2521_v50 = vld [vmem:[%s3878_s8] ss:$0 sm:$0xff] }
 0x375   : > { %v2096_v15 = vmax.f32 %v2026_v38, 0.0  ;;  %v2127_v39 = vmax.f32 %v2125_v28, %v2097_v49 }
 0x377   : > { %v2126_v22 = vmax.f32 %v2124_v45, %v2096_v15 }
 0x378   : > { %v2731_v16 = vpop.f32.mrf.mxu1 }
 0x379   : > { %v2041_v48 = vadd.f32 %v2731_v16, %v3773_v37 }
 0x37a   : > { %v2035_v57 = vpop.f32.mrf.mxu1 }
 0x37b   : > { %v2036_v42 = vadd.f32 %v3773_v37, %v2035_v57  ;;  %v2099_v13 = vmax.f32 %v2041_v48, 0.0 }
 0x37d   : > { %v2098_v46 = vmax.f32 %v2036_v42, 0.0  ;;  %v2129_v55 = vmax.f32 %v2127_v39, %v2099_v13 }
 0x37f   : > { %v2128_v53 = vmax.f32 %v2126_v22, %v2098_v46 }
 0x380   : > { %v2734_v18 = vpop.f32.mrf.mxu1 }
 0x381   : > { %v2051_v8 = vadd.f32 %v2734_v18, %v3773_v37 }
 0x382   : > { %v2045_v33 = vpop.f32.mrf.mxu1 }
 0x383   : > { %v2046_v21 = vadd.f32 %v3773_v37, %v2045_v33  ;;  %v2101_v31 = vmax.f32 %v2051_v8, 0.0 }
 0x385   : > { %v2100_v59 = vmax.f32 %v2046_v21, 0.0  ;;  %v2131_v58 = vmax.f32 %v2129_v55, %v2101_v31 }
 0x387   : > { %v2130_v16 = vmax.f32 %v2128_v53, %v2100_v59 }
 0x388   : > { %v2737_v40 = vpop.f32.mrf.mxu1 }
 0x389   : > { %v2061_v54 = vadd.f32 %v2737_v40, %v3773_v37 }
 0x38a   : > { %v2055_v29 = vpop.f32.mrf.mxu1 }
 0x38b   : > { %v2056_v47 = vadd.f32 %v3773_v37, %v2055_v29  ;;  %v2103_v57 = vmax.f32 %v2061_v54, 0.0 }
 0x38d   : > { %v2102_v23 = vmax.f32 %v2056_v47, 0.0  ;;  %v2133_v63 = vmax.f32 %v2131_v58, %v2103_v57 }
 0x38f   : > { %v2132_v24 = vmax.f32 %v2130_v16, %v2102_v23 }
 0x390   : > { %v2740_v51 = vpop.f32.mrf.mxu1 }
 0x391   : > { %v2071_v17 = vadd.f32 %v2740_v51, %v3773_v37 }
 0x392   : > { %v2065_v30 = vpop.f32.mrf.mxu1 }
 0x393   : > { %v2066_v62 = vadd.f32 %v3773_v37, %v2065_v30  ;;  %v2105_v60 = vmax.f32 %v2071_v17, 0.0  ;;  %v2239_v37 = vld [vmem:[#allocation2] sm:$0xff] }
 0x394   : > { %2628 = vmatpush3.msra.mxu1 %v2239_v37 }
 0x395   : > { %v2104_v41 = vmax.f32 %v2066_v62, 0.0  ;;  %v2135_v18 = vmax.f32 %v2133_v63, %v2105_v60 }
 0x397   : > { %v2134_v61 = vmax.f32 %v2132_v24, %v2104_v41 }
 0x399   : > { %2519 = vmatmul.mubr.msk.f32.vlgmr.msra.gmra.mxu0 %vm1709_vm4, %v2134_v61 }
 0x39a   : > { %2228 = vmatprep.mubr.f32.mxu0 %v2926_v56 }
 0x39d   : > { %2520 = vmatmul.mubr.msk.f32.gmra.mxu0 %vm1709_vm4, %v2135_v18 }
 0x459   : > { %v2224_v56 = vpop.f32.mrf.mxu0 }
 0x45a   : > { %v2225_v26 = vadd.f32 %v2224_v56, %v2145_v5 }
 0x45b   : > { %v2226_v11 = vpop.f32.mrf.mxu0 }
 0x45c   : > { %v2227_v19 = vadd.f32 %v2226_v11, %v2149_v6  ;;  %v2235_v4 = vmax.f32 %v2225_v26, 0.0 }
 0x45d   : > { %v2230_v33 = vpop.f32.mrf.mxu0 }
 0x45e   : > { %v2236_v35 = vmax.f32 %v2227_v19, 0.0  ;;  %v2231_v38 = vadd.f32 %v2230_v33, %v2145_v5 }
 0x45f   : > { %v2232_v32 = vpop.f32.mrf.mxu0 }
 0x460   : > { %v2233_v9 = vadd.f32 %v2232_v32, %v2149_v6  ;;  %2342 = vmatprep.mubr.f32.mxu1 %v2236_v35  ;;  %v2237_v40 = vmax.f32 %v2231_v38, 0.0 }
 0x461   : > { %2343 = vmatmul.mubr.f32.vlgmr.msra.gmra.mxu1 %v2235_v4 }
 0x462   : > { %v2238_v27 = vmax.f32 %v2233_v9, 0.0 }
 0x464   : > { %2347 = vmatprep.mubr.f32.mxu1 %v2238_v27 }
 0x465   : > { %2348 = vmatmul.mubr.f32.gmra.mxu1 %v2237_v40 }
 0x521   : > { %v2629_v7 = vpop.f32.mrf.mxu1 }
 0x523   : > { %v2630_v42 = vpop.f32.mrf.mxu1 }
 0x524   : > { %v2631_v20 = vadd.f32 %v2630_v42, %v2629_v7 }
 0x525   : > { %v2632_v10 = vpop.f32.mrf.mxu1 }
 0x526   : > { %v2345_v36 = vadd.f32 %v2631_v20, %v2521_v50 }
 0x527   : > { %v2633_v29 = vpop.f32.mrf.mxu1 }
 0x528   : > { %2353 = vst [vmem:[%s341_s23] sm:$0xff] %v2345_v36  ;;  %v2634_v52 = vadd.f32 %v2633_v29, %v2632_v10 }
 0x52a   : > { %v2350_v15 = vadd.f32 %v2634_v52, %v2521_v50 }
 0x52c   : > { %2354 = vst [vmem:[%s341_s23 + $0x8] sm:$0xff] %v2350_v15 }
 0x52d   : > { %2852 = shalt.err (!%p2849_p0)
}
 0x52e   : > { %s2853_s29 = scalar_lea.hbm %s3827_s27, 256  ;;  %s2857_s25 = scalar_lea.hbm %s3879_s9, 512 }
 0x52f   : > { %p2854_p1 = scmp.ne.s32.totalorder %s3827_s27, %s2853_s29  ;;  %p2858_p4 = scmp.lt.s32.totalorder %s3827_s27, %s3879_s9 }
 0x530   : > { %p2859_p7 = scmp.lt.s32.totalorder %s2857_s25, %s2853_s29 }
 0x531   : > { %p2855_p2 = pnand %p2854_p1, %p3017_p5 }
 0x532   : > { %p2860_p8 = por %p2859_p7, %p2858_p4 }
 0x533   : > { %p2856_p3 = pneg %p2855_p2 }
 0x535   : > { %p2861_p6 = pnand %p2860_p8, %p2856_p3 }
 0x537   : > { %2864 = shalt.err (!%p2861_p6)
}
 0x538   : > { %s2928_s16 = smov 128  }
 0x539   : > { %2745 = dma.vmem_to_hbm [thread:$0]  (%p3017_p5), %s3822_s21, 256, %s3827_s27, %s3829_s28, %s2928_s16, %s2928_s16, %s2924_s14  }
 0x53a PF: > { %p2757_p9 = scmp.ge.s32.totalorder %s2903_s12, 2  ;;  %s2384_s17 = sand.u32 1, %s2891_s30  }
 0x53b   : > { %p3883_p10 = scmp.ne.s32.totalorder %s3881_s20, 0  ;;  %s2385_s22 = scalar_lea.sflag [#allocation4], %s2384_s17 }
 0x53d   : > { %p2752_p11 = pnand %p2757_p9, %p3883_p10 }
 0x53f   : > { %p2753_p12 = pneg %p2752_p11 }
 0x541   : > { %2886 = dma.done.wait (%p2753_p12), %s2385_s22, 256  }
 0x542   : > { %2888 = vsyncadd (%p2753_p12), %s2385_s22, 4294967040  ;;  %p20_p13 = scmp.ge.s32.totalorder %s3004_s15, 4   ;;  %s3884_s30 = smov %s2895_s10 }
 0x543   : > { %s3885_s10 = smov %s2899_s11  ;;  %s3886_s11 = smov %s3015_s18 }
 0x544   : > { %s3887_s12 = smov %s3004_s15  ;;  %22 = sbr.rel (!%p20_p13) target bundleno = 4 (0x4), region = 96 }
 0x549   :  { %2390 = vsyncpa [#allocation3], 1 }
 0x54a   :  { %2392 = vsyncpa [#allocation3 + $0x1], 1 }
 0x54b   :  { %2393 = vsyncpa [#allocation4], 1 }
 0x54c   :  { %2395 = vsyncpa [#allocation4 + $0x1], 1 }

</bundles_post_ra>
